<compile_context>
chip_gen: v7x
topology: tpu7x:2x2x1
jax: 0.10.0
libtpu: 0.0.40
codegen_flags: <defaults>
</compile_context>

<pallas_src>
import math
import functools

import jax
import jax.numpy as jnp
from jax import lax
from jax.experimental import pallas as pl
from jax.experimental.pallas import tpu as pltpu


# ----------------------------- math helpers --------------------------------

def _layer_norm(x, gamma, beta, eps):
    mu = jnp.mean(x, axis=-1, keepdims=True)
    var = jnp.mean(jnp.square(x - mu), axis=-1, keepdims=True)
    return (x - mu) * lax.rsqrt(var + eps) * gamma + beta


def _gelu(x):
    # exact BERT gelu: x * 0.5 * (1 + erf(x / sqrt(2)))
    return 0.5 * x * (1.0 + lax.erf(x * (1.0 / math.sqrt(2.0))))


# ------------------------------- the kernel --------------------------------

def bert_layer_kernel(xf_ref, xq_ref, mask_ref,
                      wq_ref, bq_ref, wk_ref, bk_ref, wv_ref, bv_ref,
                      wo_ref, bo_ref, g1_ref, b1_ref,
                      wi_ref, bi_ref, wo2_ref, bo2_ref, g2_ref, b2_ref,
                      out_ref,
                      k_scr, v_scr,
                      *, num_heads, head_dim, ln_eps):
    qi = pl.program_id(1)

    # --- K/V projection over the full sequence, once per batch element ----
    @pl.when(qi == 0)
    def _():
        xf = xf_ref[...].astype(jnp.bfloat16)                          # (S, H)
        k = jnp.dot(xf, wk_ref[...], preferred_element_type=jnp.float32) + bk_ref[...]
        v = jnp.dot(xf, wv_ref[...], preferred_element_type=jnp.float32) + bv_ref[...]
        s_full = xf.shape[0]
        k3 = k.astype(jnp.bfloat16).reshape(s_full, num_heads, head_dim)
        v3 = v.astype(jnp.bfloat16).reshape(s_full, num_heads, head_dim)
        k_scr[...] = pltpu.einshape("snd->nsd", k3)                    # (nh, S, hd)
        v_scr[...] = pltpu.einshape("snd->nsd", v3)

    x = xq_ref[...]                            # (TQ, H) f32 (residual path)
    mask = mask_ref[...]                       # (1, S) additive mask over keys
    tq, hidden = x.shape

    x_bf = x.astype(jnp.bfloat16)

    # --- Q projection (1/sqrt(hd) folded into q) ---------------------------
    q = jnp.dot(x_bf, wq_ref[...], preferred_element_type=jnp.float32) + bq_ref[...]
    q = q * (1.0 / math.sqrt(head_dim))
    q3 = pltpu.einshape(
        "snd->nsd", q.astype(jnp.bfloat16).reshape(tq, num_heads, head_dim))

    # --- batched-heads attention (all heads in one dot_general) ------------
    scores = jnp.einsum("nqd,nkd->nqk", q3, k_scr[...],
                        preferred_element_type=jnp.float32)            # (nh, TQ, S)
    scores = scores + mask[None, :, :]                                 # bcast over heads/rows
    m = jnp.max(scores, axis=-1, keepdims=True)
    e = jnp.exp(scores - m)
    denom = jnp.sum(e, axis=-1, keepdims=True)
    probs = (e * pl.reciprocal(denom, approx=True)).astype(jnp.bfloat16)
    # attention-probs dropout is identity in eval mode
    ctx = jnp.einsum("nqk,nkd->nqd", probs, v_scr[...],
                     preferred_element_type=jnp.float32)               # (nh, TQ, hd)

    # merge heads back to (TQ, H) for the output dense
    ctx2 = pltpu.einshape("nsd->snd", ctx.astype(jnp.bfloat16)).reshape(tq, hidden)

    # --- BertSelfOutput: dense + residual + LayerNorm -----------------------
    attn = jnp.dot(ctx2, wo_ref[...], preferred_element_type=jnp.float32) + bo_ref[...]
    h1 = _layer_norm(attn + x, g1_ref[...], b1_ref[...], ln_eps)

    # --- BertIntermediate (gelu) + BertOutput (dense + residual + LN) -------
    inter = _gelu(jnp.dot(h1.astype(jnp.bfloat16), wi_ref[...],
                          preferred_element_type=jnp.float32) + bi_ref[...])
    out2 = jnp.dot(inter.astype(jnp.bfloat16), wo2_ref[...],
                   preferred_element_type=jnp.float32) + bo2_ref[...]
    y = _layer_norm(out2 + h1, g2_ref[...], b2_ref[...], ln_eps)

    out_ref[...] = y.astype(out_ref.dtype)


# ------------------------------ host wrappers -------------------------------

def _seq_tile(S, target=256):
    """Largest multiple-of-8 divisor of S that is <= target (or S itself)."""
    if S <= target:
        return S
    for t in range(target - (target % 8), 7, -8):
        if S % t == 0:
            return t
    return S


def bert_layer(x, mask, params, *, num_heads, ln_eps=1e-12, seq_tile=256):
    B, S, H = x.shape
    I = params["wi"].shape[1]
    head_dim = H // num_heads
    assert num_heads * head_dim == H

    TQ = _seq_tile(S, seq_tile)
    NQ = S // TQ

    def rep(shape):
        zeros = (0,) * len(shape)
        return pl.BlockSpec(shape, lambda b, q, _z=zeros: _z)

    in_specs = [
        pl.BlockSpec((None, S, H), lambda b, q: (b, 0, 0)),    # x: full seq (K/V proj)
        pl.BlockSpec((None, TQ, H), lambda b, q: (b, q, 0)),   # x: query tile
        pl.BlockSpec((None, 1, S), lambda b, q: (b, 0, 0)),    # attention mask
        rep((H, H)), rep((1, H)),     # wq, bq
        rep((H, H)), rep((1, H)),     # wk, bk
        rep((H, H)), rep((1, H)),     # wv, bv
        rep((H, H)), rep((1, H)),     # wo, bo   (attention output dense)
        rep((1, H)), rep((1, H)),     # ln1 gamma, beta
        rep((H, I)), rep((1, I)),     # wi, bi   (intermediate dense)
        rep((I, H)), rep((1, H)),     # wo2, bo2 (output dense)
        rep((1, H)), rep((1, H)),     # ln2 gamma, beta
    ]
    out_spec = pl.BlockSpec((None, TQ, H), lambda b, q: (b, q, 0))

    scratch = [pltpu.VMEM((num_heads, S, head_dim), jnp.bfloat16),   # K (head-major)
               pltpu.VMEM((num_heads, S, head_dim), jnp.bfloat16)]   # V (head-major)

    # Rough VMEM estimate: double-buffered inputs + scratch + live activations.
    weight_bytes = sum(int(v.size) * v.dtype.itemsize for v in params.values())
    io_bytes = S * H * 4 + 2 * TQ * H * 4 + S * 4
    act_bytes = 3 * num_heads * TQ * S * 4 + 2 * TQ * I * 4 + 6 * TQ * H * 4
    scratch_bytes = 2 * num_heads * S * head_dim * 2
    est = 2 * (weight_bytes + io_bytes) + scratch_bytes + act_bytes

    cp_kwargs = dict(dimension_semantics=("parallel", "arbitrary"))
    if est > 32 * 1024 * 1024:
        # v6e/v5e have 128 MiB physical VMEM; stay under v7x's 64 MiB.
        cp_kwargs["vmem_limit_bytes"] = int(min(est, 60 * 1024 * 1024))

    kernel = functools.partial(bert_layer_kernel, num_heads=num_heads,
                               head_dim=head_dim, ln_eps=ln_eps)

    return pl.pallas_call(
        kernel,
        out_shape=jax.ShapeDtypeStruct((B, S, H), x.dtype),
        grid=(B, NQ),
        in_specs=in_specs,
        out_specs=out_spec,
        scratch_shapes=scratch,
        compiler_params=pltpu.CompilerParams(**cp_kwargs),
    )(x, x, mask,
      params["wq"], params["bq"], params["wk"], params["bk"],
      params["wv"], params["bv"], params["wo"], params["bo"],
      params["g1"], params["b1"], params["wi"], params["bi"],
      params["wo2"], params["bo2"], params["g2"], params["b2"])


def bert_encoder(hidden_states, attention_mask, layer_params, *, num_heads):
    # Matches BertEncoder.forward with use_cache=False, output_attentions=False,
    # output_hidden_states=False: just stack the layers.
    for p in layer_params:
        hidden_states = bert_layer(hidden_states, attention_mask, p,
                                   num_heads=num_heads)
    return hidden_states


# --------------------------- pure-JAX reference -----------------------------

def bert_layer_ref(x, mask, p, *, num_heads, ln_eps=1e-12):
    B, S, H = x.shape
    hd = H // num_heads
    f32 = jnp.float32
    q = x @ p["wq"].astype(f32) + p["bq"]
    k = x @ p["wk"].astype(f32) + p["bk"]
    v = x @ p["wv"].astype(f32) + p["bv"]

    def split(t):
        return t.reshape(B, S, num_heads, hd).transpose(0, 2, 1, 3)

    q, k, v = split(q), split(k), split(v)
    scores = jnp.einsum("bnqd,bnkd->bnqk", q, k) / math.sqrt(hd)
    scores = scores + mask[:, :, None, :]
    probs = jax.nn.softmax(scores, axis=-1)
    ctx = jnp.einsum("bnqk,bnkd->bnqd", probs, v)
    ctx = ctx.transpose(0, 2, 1, 3).reshape(B, S, H)
    attn = ctx @ p["wo"].astype(f32) + p["bo"]
    h1 = _layer_norm(attn + x, p["g1"], p["b1"], ln_eps)
    inter = _gelu(h1 @ p["wi"].astype(f32) + p["bi"])
    out2 = inter @ p["wo2"].astype(f32) + p["bo2"]
    return _layer_norm(out2 + h1, p["g2"], p["b2"], ln_eps)


def bert_encoder_ref(x, mask, layer_params, *, num_heads):
    for p in layer_params:
        x = bert_layer_ref(x, mask, p, num_heads=num_heads)
    return x


# ------------------------------ parameter init ------------------------------

def init_layer_params(key, H, I):
    ks = jax.random.split(key, 6)
    s = 0.02
    bf16, f32 = jnp.bfloat16, jnp.float32
    return {
        # matmul weights stored bf16 (MXU-native); biases / LN params f32.
        # Weights are [in, out] == transpose of PyTorch nn.Linear.weight.
        "wq":  (s * jax.random.normal(ks[0], (H, H), f32)).astype(bf16),
        "bq":  jnp.zeros((1, H), f32),
        "wk":  (s * jax.random.normal(ks[1], (H, H), f32)).astype(bf16),
        "bk":  jnp.zeros((1, H), f32),
        "wv":  (s * jax.random.normal(ks[2], (H, H), f32)).astype(bf16),
        "bv":  jnp.zeros((1, H), f32),
        "wo":  (s * jax.random.normal(ks[3], (H, H), f32)).astype(bf16),
        "bo":  jnp.zeros((1, H), f32),
        "g1":  jnp.ones((1, H), f32),
        "b1":  jnp.zeros((1, H), f32),
        "wi":  (s * jax.random.normal(ks[4], (H, I), f32)).astype(bf16),
        "bi":  jnp.zeros((1, I), f32),
        "wo2": (s * jax.random.normal(ks[5], (I, H), f32)).astype(bf16),
        "bo2": jnp.zeros((1, H), f32),
        "g2":  jnp.ones((1, H), f32),
        "b2":  jnp.zeros((1, H), f32),
    }


# ----------------------------------- main -----------------------------------

if __name__ == "__main__":
    # small config: batch=2, seq=8, hidden=32, heads=4, intermediate=64, layers=2
    B, S, H = 2, 8, 32
    NUM_HEADS = 4
    INTER = 64
    NUM_LAYERS = 2

    key = jax.random.PRNGKey(0)
    k_x, k_params = jax.random.split(key)

    hidden_states = jax.random.normal(k_x, (B, S, H), jnp.float32)
    # additive attention mask (zeros == no masking, same semantics as mask=None)
    attention_mask = jnp.zeros((B, 1, S), jnp.float32)

    layer_keys = jax.random.split(k_params, NUM_LAYERS)
    layer_params = [init_layer_params(layer_keys[i], H, INTER)
                    for i in range(NUM_LAYERS)]

    out = bert_encoder(hidden_states, attention_mask, layer_params,
                       num_heads=NUM_HEADS)
    out = jax.block_until_ready(out)

    ref = bert_encoder_ref(hidden_states, attention_mask, layer_params,
                           num_heads=NUM_HEADS)
    ref = jax.block_until_ready(ref)

    assert out.shape == (B, S, H)
    assert bool(jnp.all(jnp.isfinite(out)))
    # loose tolerance: kernel uses bf16 matmul inputs + approx reciprocal
    assert bool(jnp.allclose(out, ref, atol=5e-2, rtol=5e-2))
    print("KERNEL_OK")
</pallas_src>

<mosaic_0001>
module attributes {stable_mosaic.version = 11 : i64} {
  func.func @bert_layer_kernel(%arg0: i32, %arg1: i32, %arg2: memref<1x8x32xf32, #tpu.memory_space<vmem>>, %arg3: memref<1x8x32xf32, #tpu.memory_space<vmem>>, %arg4: memref<1x1x8xf32, #tpu.memory_space<vmem>>, %arg5: memref<32x32xbf16, #tpu.memory_space<vmem>>, %arg6: memref<1x32xf32, #tpu.memory_space<vmem>>, %arg7: memref<32x32xbf16, #tpu.memory_space<vmem>>, %arg8: memref<1x32xf32, #tpu.memory_space<vmem>>, %arg9: memref<32x32xbf16, #tpu.memory_space<vmem>>, %arg10: memref<1x32xf32, #tpu.memory_space<vmem>>, %arg11: memref<32x32xbf16, #tpu.memory_space<vmem>>, %arg12: memref<1x32xf32, #tpu.memory_space<vmem>>, %arg13: memref<1x32xf32, #tpu.memory_space<vmem>>, %arg14: memref<1x32xf32, #tpu.memory_space<vmem>>, %arg15: memref<32x64xbf16, #tpu.memory_space<vmem>>, %arg16: memref<1x64xf32, #tpu.memory_space<vmem>>, %arg17: memref<64x32xbf16, #tpu.memory_space<vmem>>, %arg18: memref<1x32xf32, #tpu.memory_space<vmem>>, %arg19: memref<1x32xf32, #tpu.memory_space<vmem>>, %arg20: memref<1x32xf32, #tpu.memory_space<vmem>>, %arg21: memref<1x8x32xf32, #tpu.memory_space<vmem>>, %arg22: memref<4x8x8xbf16, #tpu.memory_space<vmem>>, %arg23: memref<4x8x8xbf16, #tpu.memory_space<vmem>>) attributes {dimension_semantics = [#tpu.dimension_semantics<parallel>, #tpu.dimension_semantics<arbitrary>], iteration_bounds = array<i64: 2, 1>, scalar_prefetch = 0 : i64, scratch_operands = 2 : i64, tpu.core_type = #tpu.core_type<tc>, window_params = [{transform_indices = @transform_0, window_bounds = array<i64: 1, 8, 32>}, {transform_indices = @transform_1, window_bounds = array<i64: 1, 8, 32>}, {transform_indices = @transform_2, window_bounds = array<i64: 1, 1, 8>}, {pipeline_mode = #tpu.pipeline_mode<synchronous>, transform_indices = @transform_3, window_bounds = array<i64: 32, 32>}, {pipeline_mode = #tpu.pipeline_mode<synchronous>, transform_indices = @transform_4, window_bounds = array<i64: 1, 32>}, {pipeline_mode = #tpu.pipeline_mode<synchronous>, transform_indices = @transform_5, window_bounds = array<i64: 32, 32>}, {pipeline_mode = #tpu.pipeline_mode<synchronous>, transform_indices = @transform_6, window_bounds = array<i64: 1, 32>}, {pipeline_mode = #tpu.pipeline_mode<synchronous>, transform_indices = @transform_7, window_bounds = array<i64: 32, 32>}, {pipeline_mode = #tpu.pipeline_mode<synchronous>, transform_indices = @transform_8, window_bounds = array<i64: 1, 32>}, {pipeline_mode = #tpu.pipeline_mode<synchronous>, transform_indices = @transform_9, window_bounds = array<i64: 32, 32>}, {pipeline_mode = #tpu.pipeline_mode<synchronous>, transform_indices = @transform_10, window_bounds = array<i64: 1, 32>}, {pipeline_mode = #tpu.pipeline_mode<synchronous>, transform_indices = @transform_11, window_bounds = array<i64: 1, 32>}, {pipeline_mode = #tpu.pipeline_mode<synchronous>, transform_indices = @transform_12, window_bounds = array<i64: 1, 32>}, {pipeline_mode = #tpu.pipeline_mode<synchronous>, transform_indices = @transform_13, window_bounds = array<i64: 32, 64>}, {pipeline_mode = #tpu.pipeline_mode<synchronous>, transform_indices = @transform_14, window_bounds = array<i64: 1, 64>}, {pipeline_mode = #tpu.pipeline_mode<synchronous>, transform_indices = @transform_15, window_bounds = array<i64: 64, 32>}, {pipeline_mode = #tpu.pipeline_mode<synchronous>, transform_indices = @transform_16, window_bounds = array<i64: 1, 32>}, {pipeline_mode = #tpu.pipeline_mode<synchronous>, transform_indices = @transform_17, window_bounds = array<i64: 1, 32>}, {pipeline_mode = #tpu.pipeline_mode<synchronous>, transform_indices = @transform_18, window_bounds = array<i64: 1, 32>}, {transform_indices = @transform_19, window_bounds = array<i64: 1, 8, 32>}]} {
    %c0_i32 = arith.constant 0 : i32
    %0 = arith.cmpi eq, %arg1, %c0_i32 : i32
    %1 = arith.extui %0 : i1 to i32
    %c0_i32_0 = arith.constant 0 : i32
    %2 = arith.cmpi ne, %1, %c0_i32_0 : i32
    scf.if %2 {
      %c0_60 = arith.constant 0 : index
      %c0_61 = arith.constant 0 : index
      %c0_62 = arith.constant 0 : index
      %117 = vector.load %arg2[%c0_60, %c0_61, %c0_62] : memref<1x8x32xf32, #tpu.memory_space<vmem>>, vector<1x8x32xf32>
      %118 = vector.shape_cast %117 : vector<1x8x32xf32> to vector<8x32xf32>
      %119 = arith.truncf %118 : vector<8x32xf32> to vector<8x32xbf16>
      %c0_63 = arith.constant 0 : index
      %c0_64 = arith.constant 0 : index
      %120 = vector.load %arg7[%c0_63, %c0_64] : memref<32x32xbf16, #tpu.memory_space<vmem>>, vector<32x32xbf16>
      %cst_65 = arith.constant dense<0.000000e+00> : vector<8x32xf32>
      %121 = tpu.matmul %119, %120, %cst_65 {dimension_numbers = #tpu.dot_dimension_numbers<[1], [0], [0], [1], [0, 0, 1, 1], [], []>} : vector<8x32xbf16>, vector<32x32xbf16>, vector<8x32xf32> -> vector<8x32xf32>
      %c0_66 = arith.constant 0 : index
      %c0_67 = arith.constant 0 : index
      %122 = vector.load %arg8[%c0_66, %c0_67] : memref<1x32xf32, #tpu.memory_space<vmem>>, vector<1x32xf32>
      %123 = vector.broadcast %122 : vector<1x32xf32> to vector<8x32xf32>
      %124 = arith.addf %121, %123 : vector<8x32xf32>
      %c0_68 = arith.constant 0 : index
      %c0_69 = arith.constant 0 : index
      %125 = vector.load %arg9[%c0_68, %c0_69] : memref<32x32xbf16, #tpu.memory_space<vmem>>, vector<32x32xbf16>
      %cst_70 = arith.constant dense<0.000000e+00> : vector<8x32xf32>
      %126 = tpu.matmul %119, %125, %cst_70 {dimension_numbers = #tpu.dot_dimension_numbers<[1], [0], [0], [1], [0, 0, 1, 1], [], []>} : vector<8x32xbf16>, vector<32x32xbf16>, vector<8x32xf32> -> vector<8x32xf32>
      %c0_71 = arith.constant 0 : index
      %c0_72 = arith.constant 0 : index
      %127 = vector.load %arg10[%c0_71, %c0_72] : memref<1x32xf32, #tpu.memory_space<vmem>>, vector<1x32xf32>
      %128 = vector.broadcast %127 : vector<1x32xf32> to vector<8x32xf32>
      %129 = arith.addf %126, %128 : vector<8x32xf32>
      %130 = arith.truncf %124 : vector<8x32xf32> to vector<8x32xbf16>
      %131 = vector.shape_cast %130 : vector<8x32xbf16> to vector<8x4x8xbf16>
      %132 = arith.truncf %129 : vector<8x32xf32> to vector<8x32xbf16>
      %133 = vector.shape_cast %132 : vector<8x32xbf16> to vector<8x4x8xbf16>
      %134 = tpu.transpose %131, [1, 0, 2] : vector<8x4x8xbf16> -> vector<4x8x8xbf16>
      %c0_73 = arith.constant 0 : index
      %c0_74 = arith.constant 0 : index
      %c0_75 = arith.constant 0 : index
      %135 = vector.load %arg22[%c0_73, %c0_74, %c0_75] : memref<4x8x8xbf16, #tpu.memory_space<vmem>>, vector<4x8x8xbf16>
      tpu.vector_store %arg22[%c0_73, %c0_74, %c0_75], %134 {strides = array<i32>} : memref<4x8x8xbf16, #tpu.memory_space<vmem>>, vector<4x8x8xbf16>,
      %136 = tpu.transpose %133, [1, 0, 2] : vector<8x4x8xbf16> -> vector<4x8x8xbf16>
      %c0_76 = arith.constant 0 : index
      %c0_77 = arith.constant 0 : index
      %c0_78 = arith.constant 0 : index
      %137 = vector.load %arg23[%c0_76, %c0_77, %c0_78] : memref<4x8x8xbf16, #tpu.memory_space<vmem>>, vector<4x8x8xbf16>
      tpu.vector_store %arg23[%c0_76, %c0_77, %c0_78], %136 {strides = array<i32>} : memref<4x8x8xbf16, #tpu.memory_space<vmem>>, vector<4x8x8xbf16>,
    } else {
    }
    %c0 = arith.constant 0 : index
    %c0_1 = arith.constant 0 : index
    %c0_2 = arith.constant 0 : index
    %3 = vector.load %arg3[%c0, %c0_1, %c0_2] : memref<1x8x32xf32, #tpu.memory_space<vmem>>, vector<1x8x32xf32>
    %4 = vector.shape_cast %3 : vector<1x8x32xf32> to vector<8x32xf32>
    %c0_3 = arith.constant 0 : index
    %c0_4 = arith.constant 0 : index
    %c0_5 = arith.constant 0 : index
    %5 = vector.load %arg4[%c0_3, %c0_4, %c0_5] : memref<1x1x8xf32, #tpu.memory_space<vmem>>, vector<1x1x8xf32>
    %6 = vector.shape_cast %5 : vector<1x1x8xf32> to vector<1x8xf32>
    %7 = arith.truncf %4 : vector<8x32xf32> to vector<8x32xbf16>
    %c0_6 = arith.constant 0 : index
    %c0_7 = arith.constant 0 : index
    %8 = vector.load %arg5[%c0_6, %c0_7] : memref<32x32xbf16, #tpu.memory_space<vmem>>, vector<32x32xbf16>
    %cst = arith.constant dense<0.000000e+00> : vector<8x32xf32>
    %9 = tpu.matmul %7, %8, %cst {dimension_numbers = #tpu.dot_dimension_numbers<[1], [0], [0], [1], [0, 0, 1, 1], [], []>} : vector<8x32xbf16>, vector<32x32xbf16>, vector<8x32xf32> -> vector<8x32xf32>
    %c0_8 = arith.constant 0 : index
    %c0_9 = arith.constant 0 : index
    %10 = vector.load %arg6[%c0_8, %c0_9] : memref<1x32xf32, #tpu.memory_space<vmem>>, vector<1x32xf32>
    %11 = vector.broadcast %10 : vector<1x32xf32> to vector<8x32xf32>
    %12 = arith.addf %9, %11 : vector<8x32xf32>
    %cst_10 = arith.constant 0.353553385 : f32
    %13 = vector.broadcast %cst_10 : f32 to vector<8x32xf32>
    %14 = arith.mulf %12, %13 : vector<8x32xf32>
    %15 = arith.truncf %14 : vector<8x32xf32> to vector<8x32xbf16>
    %16 = vector.shape_cast %15 : vector<8x32xbf16> to vector<8x4x8xbf16>
    %17 = tpu.transpose %16, [1, 0, 2] : vector<8x4x8xbf16> -> vector<4x8x8xbf16>
    %c0_11 = arith.constant 0 : index
    %c0_12 = arith.constant 0 : index
    %c0_13 = arith.constant 0 : index
    %18 = vector.load %arg22[%c0_11, %c0_12, %c0_13] : memref<4x8x8xbf16, #tpu.memory_space<vmem>>, vector<4x8x8xbf16>
    "tpu.trace_start"() <{level = 10 : i32, message = "nqd,nkd->nqk"}> : () -> ()
    %cst_14 = arith.constant dense<0.000000e+00> : vector<4x8x8xf32>
    %19 = tpu.matmul %17, %18, %cst_14 {dimension_numbers = #tpu.dot_dimension_numbers<[2], [2], [1], [1], [0, 0, 0, 1, 1, 1], [0], [0]>} : vector<4x8x8xbf16>, vector<4x8x8xbf16>, vector<4x8x8xf32> -> vector<4x8x8xf32>
    "tpu.trace_stop"() : () -> ()
    %20 = vector.shape_cast %6 : vector<1x8xf32> to vector<1x1x8xf32>
    %21 = vector.broadcast %20 : vector<1x1x8xf32> to vector<4x8x8xf32>
    %22 = arith.addf %19, %21 : vector<4x8x8xf32>
    %cst_15 = arith.constant dense<0xFF800000> : vector<4x8xf32>
    %23 = vector.multi_reduction <maximumf>, %22, %cst_15 [2] : vector<4x8x8xf32> to vector<4x8xf32>
    %24 = vector.shape_cast %23 : vector<4x8xf32> to vector<4x8x1xf32>
    %25 = vector.broadcast %24 : vector<4x8x1xf32> to vector<4x8x8xf32>
    %26 = arith.subf %22, %25 : vector<4x8x8xf32>
    %27 = math.exp %26 : vector<4x8x8xf32>
    %cst_16 = arith.constant dense<0.000000e+00> : vector<4x8xf32>
    %28 = vector.multi_reduction <add>, %27, %cst_16 [2] : vector<4x8x8xf32> to vector<4x8xf32>
    %29 = vector.shape_cast %28 : vector<4x8xf32> to vector<4x8x1xf32>
    %30 = tpu.reciprocal %29 {approx = true} : vector<4x8x1xf32> -> vector<4x8x1xf32>
    %31 = vector.broadcast %30 : vector<4x8x1xf32> to vector<4x8x8xf32>
    %32 = arith.mulf %27, %31 : vector<4x8x8xf32>
    %33 = arith.truncf %32 : vector<4x8x8xf32> to vector<4x8x8xbf16>
    %c0_17 = arith.constant 0 : index
    %c0_18 = arith.constant 0 : index
    %c0_19 = arith.constant 0 : index
    %34 = vector.load %arg23[%c0_17, %c0_18, %c0_19] : memref<4x8x8xbf16, #tpu.memory_space<vmem>>, vector<4x8x8xbf16>
    "tpu.trace_start"() <{level = 10 : i32, message = "nqk,nkd->nqd"}> : () -> ()
    %cst_20 = arith.constant dense<0.000000e+00> : vector<4x8x8xf32>
    %35 = tpu.matmul %33, %34, %cst_20 {dimension_numbers = #tpu.dot_dimension_numbers<[2], [1], [1], [2], [0, 0, 0, 1, 1, 2], [0], [0]>} : vector<4x8x8xbf16>, vector<4x8x8xbf16>, vector<4x8x8xf32> -> vector<4x8x8xf32>
    "tpu.trace_stop"() : () -> ()
    %36 = arith.truncf %35 : vector<4x8x8xf32> to vector<4x8x8xbf16>
    %37 = tpu.transpose %36, [1, 0, 2] : vector<4x8x8xbf16> -> vector<8x4x8xbf16>
    %38 = vector.shape_cast %37 : vector<8x4x8xbf16> to vector<8x32xbf16>
    %c0_21 = arith.constant 0 : index
    %c0_22 = arith.constant 0 : index
    %39 = vector.load %arg11[%c0_21, %c0_22] : memref<32x32xbf16, #tpu.memory_space<vmem>>, vector<32x32xbf16>
    %cst_23 = arith.constant dense<0.000000e+00> : vector<8x32xf32>
    %40 = tpu.matmul %38, %39, %cst_23 {dimension_numbers = #tpu.dot_dimension_numbers<[1], [0], [0], [1], [0, 0, 1, 1], [], []>} : vector<8x32xbf16>, vector<32x32xbf16>, vector<8x32xf32> -> vector<8x32xf32>
    %c0_24 = arith.constant 0 : index
    %c0_25 = arith.constant 0 : index
    %41 = vector.load %arg12[%c0_24, %c0_25] : memref<1x32xf32, #tpu.memory_space<vmem>>, vector<1x32xf32>
    %42 = vector.broadcast %41 : vector<1x32xf32> to vector<8x32xf32>
    %43 = arith.addf %40, %42 : vector<8x32xf32>
    %44 = arith.addf %43, %4 : vector<8x32xf32>
    %c0_26 = arith.constant 0 : index
    %c0_27 = arith.constant 0 : index
    %45 = vector.load %arg13[%c0_26, %c0_27] : memref<1x32xf32, #tpu.memory_space<vmem>>, vector<1x32xf32>
    %c0_28 = arith.constant 0 : index
    %c0_29 = arith.constant 0 : index
    %46 = vector.load %arg14[%c0_28, %c0_29] : memref<1x32xf32, #tpu.memory_space<vmem>>, vector<1x32xf32>
    %cst_30 = arith.constant dense<0.000000e+00> : vector<8xf32>
    %47 = vector.multi_reduction <add>, %44, %cst_30 [1] : vector<8x32xf32> to vector<8xf32>
    %48 = vector.shape_cast %47 : vector<8xf32> to vector<8x1xf32>
    %cst_31 = arith.constant 3.200000e+01 : f32
    %49 = vector.broadcast %cst_31 : f32 to vector<8x1xf32>
    %50 = arith.divf %48, %49 : vector<8x1xf32>
    %51 = vector.broadcast %50 : vector<8x1xf32> to vector<8x32xf32>
    %52 = arith.subf %44, %51 : vector<8x32xf32>
    %53 = arith.mulf %52, %52 : vector<8x32xf32>
    %cst_32 = arith.constant dense<0.000000e+00> : vector<8xf32>
    %54 = vector.multi_reduction <add>, %53, %cst_32 [1] : vector<8x32xf32> to vector<8xf32>
    %55 = vector.shape_cast %54 : vector<8xf32> to vector<8x1xf32>
    %cst_33 = arith.constant 3.200000e+01 : f32
    %56 = vector.broadcast %cst_33 : f32 to vector<8x1xf32>
    %57 = arith.divf %55, %56 : vector<8x1xf32>
    %58 = vector.broadcast %50 : vector<8x1xf32> to vector<8x32xf32>
    %59 = arith.subf %44, %58 : vector<8x32xf32>
    %cst_34 = arith.constant 9.99999996E-13 : f32
    %60 = vector.broadcast %cst_34 : f32 to vector<8x1xf32>
    %61 = arith.addf %57, %60 : vector<8x1xf32>
    %62 = math.rsqrt %61 : vector<8x1xf32>
    %63 = vector.broadcast %62 : vector<8x1xf32> to vector<8x32xf32>
    %64 = arith.mulf %59, %63 : vector<8x32xf32>
    %65 = vector.broadcast %45 : vector<1x32xf32> to vector<8x32xf32>
    %66 = arith.mulf %64, %65 : vector<8x32xf32>
    %67 = vector.broadcast %46 : vector<1x32xf32> to vector<8x32xf32>
    %68 = arith.addf %66, %67 : vector<8x32xf32>
    %69 = arith.truncf %68 : vector<8x32xf32> to vector<8x32xbf16>
    %c0_35 = arith.constant 0 : index
    %c0_36 = arith.constant 0 : index
    %70 = vector.load %arg15[%c0_35, %c0_36] : memref<32x64xbf16, #tpu.memory_space<vmem>>, vector<32x64xbf16>
    %cst_37 = arith.constant dense<0.000000e+00> : vector<8x64xf32>
    %71 = tpu.matmul %69, %70, %cst_37 {dimension_numbers = #tpu.dot_dimension_numbers<[1], [0], [0], [1], [0, 0, 1, 1], [], []>} : vector<8x32xbf16>, vector<32x64xbf16>, vector<8x64xf32> -> vector<8x64xf32>
    %c0_38 = arith.constant 0 : index
    %c0_39 = arith.constant 0 : index
    %72 = vector.load %arg16[%c0_38, %c0_39] : memref<1x64xf32, #tpu.memory_space<vmem>>, vector<1x64xf32>
    %73 = vector.broadcast %72 : vector<1x64xf32> to vector<8x64xf32>
    %74 = arith.addf %71, %73 : vector<8x64xf32>
    %cst_40 = arith.constant 5.000000e-01 : f32
    %75 = vector.broadcast %cst_40 : f32 to vector<8x64xf32>
    %76 = arith.mulf %75, %74 : vector<8x64xf32>
    %cst_41 = arith.constant 0.707106769 : f32
    %77 = vector.broadcast %cst_41 : f32 to vector<8x64xf32>
    %78 = arith.mulf %74, %77 : vector<8x64xf32>
    %79 = math.erf %78 : vector<8x64xf32>
    %cst_42 = arith.constant 1.000000e+00 : f32
    %80 = vector.broadcast %cst_42 : f32 to vector<8x64xf32>
    %81 = arith.addf %80, %79 : vector<8x64xf32>
    %82 = arith.mulf %76, %81 : vector<8x64xf32>
    %83 = arith.truncf %82 : vector<8x64xf32> to vector<8x64xbf16>
    %c0_43 = arith.constant 0 : index
    %c0_44 = arith.constant 0 : index
    %84 = vector.load %arg17[%c0_43, %c0_44] : memref<64x32xbf16, #tpu.memory_space<vmem>>, vector<64x32xbf16>
    %cst_45 = arith.constant dense<0.000000e+00> : vector<8x32xf32>
    %85 = tpu.matmul %83, %84, %cst_45 {dimension_numbers = #tpu.dot_dimension_numbers<[1], [0], [0], [1], [0, 0, 1, 1], [], []>} : vector<8x64xbf16>, vector<64x32xbf16>, vector<8x32xf32> -> vector<8x32xf32>
    %c0_46 = arith.constant 0 : index
    %c0_47 = arith.constant 0 : index
    %86 = vector.load %arg18[%c0_46, %c0_47] : memref<1x32xf32, #tpu.memory_space<vmem>>, vector<1x32xf32>
    %87 = vector.broadcast %86 : vector<1x32xf32> to vector<8x32xf32>
    %88 = arith.addf %85, %87 : vector<8x32xf32>
    %89 = arith.addf %88, %68 : vector<8x32xf32>
    %c0_48 = arith.constant 0 : index
    %c0_49 = arith.constant 0 : index
    %90 = vector.load %arg19[%c0_48, %c0_49] : memref<1x32xf32, #tpu.memory_space<vmem>>, vector<1x32xf32>
    %c0_50 = arith.constant 0 : index
    %c0_51 = arith.constant 0 : index
    %91 = vector.load %arg20[%c0_50, %c0_51] : memref<1x32xf32, #tpu.memory_space<vmem>>, vector<1x32xf32>
    %cst_52 = arith.constant dense<0.000000e+00> : vector<8xf32>
    %92 = vector.multi_reduction <add>, %89, %cst_52 [1] : vector<8x32xf32> to vector<8xf32>
    %93 = vector.shape_cast %92 : vector<8xf32> to vector<8x1xf32>
    %cst_53 = arith.constant 3.200000e+01 : f32
    %94 = vector.broadcast %cst_53 : f32 to vector<8x1xf32>
    %95 = arith.divf %93, %94 : vector<8x1xf32>
    %96 = vector.broadcast %95 : vector<8x1xf32> to vector<8x32xf32>
    %97 = arith.subf %89, %96 : vector<8x32xf32>
    %98 = arith.mulf %97, %97 : vector<8x32xf32>
    %cst_54 = arith.constant dense<0.000000e+00> : vector<8xf32>
    %99 = vector.multi_reduction <add>, %98, %cst_54 [1] : vector<8x32xf32> to vector<8xf32>
    %100 = vector.shape_cast %99 : vector<8xf32> to vector<8x1xf32>
    %cst_55 = arith.constant 3.200000e+01 : f32
    %101 = vector.broadcast %cst_55 : f32 to vector<8x1xf32>
    %102 = arith.divf %100, %101 : vector<8x1xf32>
    %103 = vector.broadcast %95 : vector<8x1xf32> to vector<8x32xf32>
    %104 = arith.subf %89, %103 : vector<8x32xf32>
    %cst_56 = arith.constant 9.99999996E-13 : f32
    %105 = vector.broadcast %cst_56 : f32 to vector<8x1xf32>
    %106 = arith.addf %102, %105 : vector<8x1xf32>
    %107 = math.rsqrt %106 : vector<8x1xf32>
    %108 = vector.broadcast %107 : vector<8x1xf32> to vector<8x32xf32>
    %109 = arith.mulf %104, %108 : vector<8x32xf32>
    %110 = vector.broadcast %90 : vector<1x32xf32> to vector<8x32xf32>
    %111 = arith.mulf %109, %110 : vector<8x32xf32>
    %112 = vector.broadcast %91 : vector<1x32xf32> to vector<8x32xf32>
    %113 = arith.addf %111, %112 : vector<8x32xf32>
    %c0_57 = arith.constant 0 : index
    %c0_58 = arith.constant 0 : index
    %c0_59 = arith.constant 0 : index
    %114 = vector.load %arg21[%c0_57, %c0_58, %c0_59] : memref<1x8x32xf32, #tpu.memory_space<vmem>>, vector<1x8x32xf32>
    %115 = vector.shape_cast %114 : vector<1x8x32xf32> to vector<8x32xf32>
    %116 = vector.shape_cast %113 : vector<8x32xf32> to vector<1x8x32xf32>
    tpu.vector_store %arg21[%c0_57, %c0_58, %c0_59], %116 {strides = array<i32>} : memref<1x8x32xf32, #tpu.memory_space<vmem>>, vector<1x8x32xf32>,
    return
  }
  func.func @transform_0(%arg0: i32, %arg1: i32) -> (i32, i32, i32) {
    %c0_i32 = arith.constant 0 : i32
    %c0_i32_0 = arith.constant 0 : i32
    %c0_i32_1 = arith.constant 0 : i32
    return %arg0, %c0_i32, %c0_i32_0 : i32, i32, i32
  }
  func.func @transform_1(%arg0: i32, %arg1: i32) -> (i32, i32, i32) {
    %c0_i32 = arith.constant 0 : i32
    %c0_i32_0 = arith.constant 0 : i32
    return %arg0, %arg1, %c0_i32 : i32, i32, i32
  }
  func.func @transform_2(%arg0: i32, %arg1: i32) -> (i32, i32, i32) {
    %c0_i32 = arith.constant 0 : i32
    %c0_i32_0 = arith.constant 0 : i32
    %c0_i32_1 = arith.constant 0 : i32
    return %arg0, %c0_i32, %c0_i32_0 : i32, i32, i32
  }
  func.func @transform_3(%arg0: i32, %arg1: i32) -> (i32, i32) {
    %c0_i32 = arith.constant 0 : i32
    %c0_i32_0 = arith.constant 0 : i32
    %c0_i32_1 = arith.constant 0 : i32
    return %c0_i32, %c0_i32_0 : i32, i32
  }
  func.func @transform_4(%arg0: i32, %arg1: i32) -> (i32, i32) {
    %c0_i32 = arith.constant 0 : i32
    %c0_i32_0 = arith.constant 0 : i32
    %c0_i32_1 = arith.constant 0 : i32
    return %c0_i32, %c0_i32_0 : i32, i32
  }
  func.func @transform_5(%arg0: i32, %arg1: i32) -> (i32, i32) {
    %c0_i32 = arith.constant 0 : i32
    %c0_i32_0 = arith.constant 0 : i32
    %c0_i32_1 = arith.constant 0 : i32
    return %c0_i32, %c0_i32_0 : i32, i32
  }
  func.func @transform_6(%arg0: i32, %arg1: i32) -> (i32, i32) {
    %c0_i32 = arith.constant 0 : i32
    %c0_i32_0 = arith.constant 0 : i32
    %c0_i32_1 = arith.constant 0 : i32
    return %c0_i32, %c0_i32_0 : i32, i32
  }
  func.func @transform_7(%arg0: i32, %arg1: i32) -> (i32, i32) {
    %c0_i32 = arith.constant 0 : i32
    %c0_i32_0 = arith.constant 0 : i32
    %c0_i32_1 = arith.constant 0 : i32
    return %c0_i32, %c0_i32_0 : i32, i32
  }
  func.func @transform_8(%arg0: i32, %arg1: i32) -> (i32, i32) {
    %c0_i32 = arith.constant 0 : i32
    %c0_i32_0 = arith.constant 0 : i32
    %c0_i32_1 = arith.constant 0 : i32
    return %c0_i32, %c0_i32_0 : i32, i32
  }
  func.func @transform_9(%arg0: i32, %arg1: i32) -> (i32, i32) {
    %c0_i32 = arith.constant 0 : i32
    %c0_i32_0 = arith.constant 0 : i32
    %c0_i32_1 = arith.constant 0 : i32
    return %c0_i32, %c0_i32_0 : i32, i32
  }
  func.func @transform_10(%arg0: i32, %arg1: i32) -> (i32, i32) {
    %c0_i32 = arith.constant 0 : i32
    %c0_i32_0 = arith.constant 0 : i32
    %c0_i32_1 = arith.constant 0 : i32
    return %c0_i32, %c0_i32_0 : i32, i32
  }
  func.func @transform_11(%arg0: i32, %arg1: i32) -> (i32, i32) {
    %c0_i32 = arith.constant 0 : i32
    %c0_i32_0 = arith.constant 0 : i32
    %c0_i32_1 = arith.constant 0 : i32
    return %c0_i32, %c0_i32_0 : i32, i32
  }
  func.func @transform_12(%arg0: i32, %arg1: i32) -> (i32, i32) {
    %c0_i32 = arith.constant 0 : i32
    %c0_i32_0 = arith.constant 0 : i32
    %c0_i32_1 = arith.constant 0 : i32
    return %c0_i32, %c0_i32_0 : i32, i32
  }
  func.func @transform_13(%arg0: i32, %arg1: i32) -> (i32, i32) {
    %c0_i32 = arith.constant 0 : i32
    %c0_i32_0 = arith.constant 0 : i32
    %c0_i32_1 = arith.constant 0 : i32
    return %c0_i32, %c0_i32_0 : i32, i32
  }
  func.func @transform_14(%arg0: i32, %arg1: i32) -> (i32, i32) {
    %c0_i32 = arith.constant 0 : i32
    %c0_i32_0 = arith.constant 0 : i32
    %c0_i32_1 = arith.constant 0 : i32
    return %c0_i32, %c0_i32_0 : i32, i32
  }
  func.func @transform_15(%arg0: i32, %arg1: i32) -> (i32, i32) {
    %c0_i32 = arith.constant 0 : i32
    %c0_i32_0 = arith.constant 0 : i32
    %c0_i32_1 = arith.constant 0 : i32
    return %c0_i32, %c0_i32_0 : i32, i32
  }
  func.func @transform_16(%arg0: i32, %arg1: i32) -> (i32, i32) {
    %c0_i32 = arith.constant 0 : i32
    %c0_i32_0 = arith.constant 0 : i32
    %c0_i32_1 = arith.constant 0 : i32
    return %c0_i32, %c0_i32_0 : i32, i32
  }
  func.func @transform_17(%arg0: i32, %arg1: i32) -> (i32, i32) {
    %c0_i32 = arith.constant 0 : i32
    %c0_i32_0 = arith.constant 0 : i32
    %c0_i32_1 = arith.constant 0 : i32
    return %c0_i32, %c0_i32_0 : i32, i32
  }
  func.func @transform_18(%arg0: i32, %arg1: i32) -> (i32, i32) {
    %c0_i32 = arith.constant 0 : i32
    %c0_i32_0 = arith.constant 0 : i32
    %c0_i32_1 = arith.constant 0 : i32
    return %c0_i32, %c0_i32_0 : i32, i32
  }
  func.func @transform_19(%arg0: i32, %arg1: i32) -> (i32, i32, i32) {
    %c0_i32 = arith.constant 0 : i32
    %c0_i32_0 = arith.constant 0 : i32
    return %arg0, %arg1, %c0_i32 : i32, i32, i32
  }
}

</mosaic_0001>

<bundles_post_ra>
// kernel: tpu_custom_call.1
= control target key start
LH: loop header
LB: loop body
LE: loop exit
PB: predicated region body
PF: predicated region fallthrough
CT: control target
= control target key end

     0   :  { %s4027_s0 = inlined_call_operand.vmem [shape: f32[2,8,32], index: 0, kind: input, shape index: {}]   ;;  %s4028_s1 = inlined_call_operand.vmem [shape: f32[2,8,32], index: 1, kind: input, shape index: {}]   ;;  %s4029_s2 = inlined_call_operand.hbm [shape: f32[2,1,8], index: 2, kind: input, shape index: {}]   ;;  %s4030_s3 = inlined_call_operand.vmem [shape: bf16[32,32], index: 3, kind: input, shape index: {}]   ;;  %s4031_s4 = inlined_call_operand.vmem [shape: f32[1,32], index: 4, kind: input, shape index: {}]   ;;  %s4032_s5 = inlined_call_operand.hbm [shape: bf16[32,32], index: 5, kind: input, shape index: {}]   ;;  %s4033_s6 = inlined_call_operand.hbm [shape: f32[1,32], index: 6, kind: input, shape index: {}]   ;;  %s4034_s7 = inlined_call_operand.hbm [shape: bf16[32,32], index: 7, kind: input, shape index: {}]   ;;  %s4035_s8 = inlined_call_operand.hbm [shape: f32[1,32], index: 8, kind: input, shape index: {}]   ;;  %s4036_s9 = inlined_call_operand.vmem [shape: bf16[32,32], index: 9, kind: input, shape index: {}]   ;;  %s4037_s10 = inlined_call_operand.hbm [shape: f32[1,32], index: 10, kind: input, shape index: {}]   ;;  %s4038_s11 = inlined_call_operand.hbm [shape: f32[1,32], index: 11, kind: input, shape index: {}]   ;;  %s4039_s12 = inlined_call_operand.hbm [shape: f32[1,32], index: 12, kind: input, shape index: {}]   ;;  %s4040_s13 = inlined_call_operand.vmem [shape: bf16[32,64], index: 13, kind: input, shape index: {}]   ;;  %s4041_s14 = inlined_call_operand.vmem [shape: f32[1,64], index: 14, kind: input, shape index: {}]   ;;  %s4042_s15 = inlined_call_operand.vmem [shape: bf16[64,32], index: 15, kind: input, shape index: {}]   ;;  %s4043_s16 = inlined_call_operand.vmem [shape: f32[1,32], index: 16, kind: input, shape index: {}]   ;;  %s4044_s17 = inlined_call_operand.vmem [shape: f32[1,32], index: 17, kind: input, shape index: {}]   ;;  %s4045_s18 = inlined_call_operand.vmem [shape: f32[1,32], index: 18, kind: input, shape index: {}]   ;;  %s4046_s19 = inlined_call_operand.hbm [shape: f32[2,8,32], index: 19, kind: output, shape index: {}]  }
   0x1   :  { %4060 = sst [smem:[#allocation25_spill]] %s4027_s0 }
   0x2   :  { %4061 = sst [smem:[#allocation26_spill]] %s4028_s1 }
   0x3   :  { %4062 = sst [smem:[#allocation27_spill]] %s4029_s2 }
   0x4   :  { %4063 = sst [smem:[#allocation28_spill]] %s4030_s3 }
   0x5   :  { %4064 = sst [smem:[#allocation29_spill]] %s4031_s4 }
   0x6   :  { %4065 = sst [smem:[#allocation30_spill]] %s4032_s5 }
   0x7   :  { %4066 = sst [smem:[#allocation31_spill]] %s4033_s6 }
   0x8   :  { %4067 = sst [smem:[#allocation32_spill]] %s4034_s7 }
   0x9   :  { %4068 = sst [smem:[#allocation33_spill]] %s4035_s8 }
   0xa   :  { %4069 = sst [smem:[#allocation34_spill]] %s4036_s9 }
   0xb   :  { %4070 = sst [smem:[#allocation35_spill]] %s4040_s13 }
   0xc   :  { %4071 = sst [smem:[#allocation36_spill]] %s4041_s14 }
   0xd   :  { %4072 = sst [smem:[#allocation37_spill]] %s4042_s15 }
   0xe   :  { %4073 = sst [smem:[#allocation38_spill]] %s4043_s16 }
   0xf   :  { %4074 = sst [smem:[#allocation39_spill]] %s4044_s17 }
  0x10   :  { %4075 = sst [smem:[#allocation40_spill]] %s4045_s18 }
  0x11   :  { %4076 = sst [smem:[#allocation41_spill]] %s4046_s19 }
  0x12   :  { %24 = vsyncpa [#allocation5], 0 }
  0x13   :  { %26 = vsyncpa [#allocation5 + $0x1], 0 }
  0x14   :  { %27 = vsyncpa [#allocation8], 0 }
  0x15   :  { %28 = vsyncpa [#allocation11], 0 }
  0x16   :  { %29 = vsyncpa [#allocation14], 0 }
  0x17   :  { %30 = vsyncpa [#allocation17], 0 }
  0x18   :  { %31 = vsyncpa [#allocation6], 0 }
  0x19   :  { %33 = vsyncpa [#allocation6 + $0x1], 0  ;;  %s3407_s0 = smov 0   ;;  %s3409_s30 = smov 0  }
  0x1a   :  { %s3411_s20 = smov 0   ;;  %s3413_s21 = smov 0  }
  0x1b   :  { %s3415_s1 = smov 0   ;;  %s3417_s22 = smov 0  }
  0x1c LB: > { %s4049_s2 = sadd.s32 4294967295, %s3283_s22   ;;  %p2577_p0 = scmp.ge.s32.totalorder %s3283_s22, 1  ;;  %s3283_s22 = sphi %s3417_s22, %s39_s22   ;;  %s3279_s1 = sphi %s3415_s1, %s4115_s1   ;;  %s3275_s21 = sphi %s3413_s21, %s4114_s21   ;;  %s3271_s20 = sphi %s3411_s20, %s4113_s20   ;;  %s3267_s30 = sphi %s3409_s30, %s4112_s30   ;;  %s3263_s0 = sphi %s3407_s0, %s4111_s0  }
  0x1d   : > { %p3441_p1 = scmp.eq.s32.totalorder %s4049_s2, 0  ;;  %p500_p2 = scmp.lt.s32.totalorder %s3283_s22, 3 }
  0x1e   : > { %s3285_s25 = smov [#allocation7]   ;;  %s3286_s27 = smov [#allocation10]  }
  0x1f   : > { %s4077_s23 = scalar_select %p3441_p1, 1, 0 }
  0x20   : > { %p3446_p3 = pnand %p2577_p0, %p500_p2  ;;  %s518_s3 = sshll.u32 %s3285_s25, 4  ;;  %s3450_s3 = int_to_ptr.vmem [resolvable:$true] %s518_s3 }
  0x21   : > { %s542_s28 = sshll.u32 %s3286_s27, 4  ;;  %s3287_s29 = smov [#allocation13]   ;;  %s3461_s28 = int_to_ptr.vmem [resolvable:$true] %s542_s28 }
  0x22   : > { %s4078_s24 = scalar_select %p3446_p3, 1, 0 }
  0x23   : > { %p2809_p4 = pneg %p3446_p3  ;;  %s3463_s2 = sshll.u32 %s3287_s29, 4  ;;  %s571_s2 = int_to_ptr.vmem [resolvable:$true] %s3463_s2 }
  0x24   : > { %s4080_s5 = sld [smem:[#allocation30_spill]] }
  0x25   : > { %p3457_p6 = pnand %p2809_p4, %p3441_p1 }
  0x27   : > { %p3473_p8 = pneg %p3457_p6 }
  0x2a   : > { %s2959_s18 = scalar_lea.hbm %s4080_s5, 256 }
  0x2b   : > { %p2960_p7 = scmp.ne.s32.totalorder %s4080_s5, %s2959_s18  ;;  %p2966_p11 = scmp.lt.u32.totalorder %s2959_s18, %s4080_s5 }
  0x2d   : > { %p2962_p9 = pnand %p3473_p8, %p2960_p7 }
  0x2f   : > { %p2963_p10 = pneg %p2962_p9 }
  0x31   : > { %p2968_p12 = pnand %p2966_p11, %p2963_p10 }
  0x33   : > { %2971 = shalt.err (!%p2968_p12)
}
  0x34   : > { %s2972_s16 = scalar_lea.vmem %s3450_s3, 256  ;;  %p2980_p4 = scmp.lt.s32.totalorder %s3450_s3, %s3450_s3 }
  0x35   : > { %p2973_p13 = scmp.ne.s32.totalorder %s3450_s3, %s2972_s16  ;;  %p2981_p5 = scmp.lt.s32.totalorder %s2972_s16, %s2972_s16 }
  0x37   : > { %p2975_p0 = pnand %p2973_p13, %p3473_p8  ;;  %p2982_p7 = por %p2981_p5, %p2980_p4 }
  0x39   : > { %p2976_p2 = pneg %p2975_p0 }
  0x3b   : > { %p2983_p9 = pnand %p2982_p7, %p2976_p2 }
  0x3d   : > { %2986 = shalt.err (!%p2983_p9)
}
  0x3e   : > { %s3288_s17 = smov 64   ;;  %s3289_s18 = smov 4  }
  0x3f   : > { %2812 = dma.hbm_to_vmem [thread:$0]  (!%p3457_p6), %s4080_s5, 256, %s3450_s3, [#allocation8], %s3288_s17, %s3288_s17, %s3289_s18  }
  0x40   : > { %s4082_s7 = sld [smem:[#allocation32_spill]] }
  0x46   : > { %s2987_s15 = scalar_lea.hbm %s4082_s7, 256 }
  0x47   : > { %p2988_p5 = scmp.ne.s32.totalorder %s4082_s7, %s2987_s15  ;;  %p2994_p12 = scmp.lt.u32.totalorder %s2987_s15, %s4082_s7 }
  0x49   : > { %p2990_p10 = pnand %p2988_p5, %p3473_p8 }
  0x4b   : > { %p2991_p11 = pneg %p2990_p10 }
  0x4d   : > { %p2996_p13 = pnand %p2994_p12, %p2991_p11 }
  0x4f   : > { %2999 = shalt.err (!%p2996_p13)
}
  0x50   : > { %s3000_s3 = scalar_lea.vmem %s3461_s28, 256  ;;  %p3008_p7 = scmp.lt.s32.totalorder %s3461_s28, %s3461_s28 }
  0x51   : > { %p3001_p0 = scmp.ne.s32.totalorder %s3461_s28, %s3000_s3  ;;  %p3009_p9 = scmp.lt.s32.totalorder %s3000_s3, %s3000_s3 }
  0x53   : > { %p3003_p2 = pnand %p3001_p0, %p3473_p8  ;;  %p3010_p5 = por %p3009_p9, %p3008_p7 }
  0x55   : > { %p3004_p4 = pneg %p3003_p2 }
  0x57   : > { %p3011_p10 = pnand %p3010_p5, %p3004_p4 }
  0x59   : > { %3014 = shalt.err (!%p3011_p10)
}
  0x5a   : > { %2818 = dma.hbm_to_vmem [thread:$0]  (!%p3457_p6), %s4082_s7, 256, %s3461_s28, [#allocation11], %s3288_s17, %s3288_s17, %s3289_s18  }
  0x5b   : > { %s3015_s19 = scalar_lea.hbm %s4037_s10, 16 }
  0x5c   : > { %p3016_p11 = scmp.ne.s32.totalorder %s4037_s10, %s3015_s19  ;;  %p3022_p0 = scmp.lt.u32.totalorder %s3015_s19, %s4037_s10 }
  0x5e   : > { %p3018_p12 = pnand %p3016_p11, %p3473_p8 }
  0x60   : > { %p3019_p13 = pneg %p3018_p12 }
  0x62   : > { %p3024_p2 = pnand %p3022_p0, %p3019_p13 }
  0x64   : > { %3027 = shalt.err (!%p3024_p2)
}
  0x65   : > { %s3028_s3 = scalar_lea.vmem %s571_s2, 16  ;;  %s3035_s28 = scalar_lea.vmem %s571_s2, 32 }
  0x66   : > { %p3029_p4 = scmp.ne.s32.totalorder %s571_s2, %s3028_s3  ;;  %p3036_p5 = scmp.lt.s32.totalorder %s571_s2, %s571_s2 }
  0x67   : > { %p3037_p10 = scmp.lt.s32.totalorder %s3035_s28, %s3028_s3 }
  0x68   : > { %p3031_p7 = pnand %p3029_p4, %p3473_p8 }
  0x69   : > { %p3038_p3 = por %p3037_p10, %p3036_p5 }
  0x6a   : > { %p3032_p9 = pneg %p3031_p7 }
  0x6c   : > { %p3039_p1 = pnand %p3038_p3, %p3032_p9 }
  0x6e   : > { %3042 = shalt.err (!%p3039_p1)
}
  0x6f   : > { %2824 = dma.hbm_to_vmem [thread:$0]  (!%p3457_p6), %s4037_s10, 16, %s571_s2, [#allocation14]  }
  0x70   : > { %s3290_s4 = smov [#allocation9]   ;;  %s3291_s13 = smov [#allocation12]  }
  0x71   : > { %s532_s9 = sshll.u32 %s3290_s4, 4  ;;  %s556_s15 = sshll.u32 %s3291_s13, 4  ;;  %s533_s9 = int_to_ptr.vmem [resolvable:$true] %s532_s9  ;;  %s557_s15 = int_to_ptr.vmem [resolvable:$true] %s556_s15 }
  0x72   : > { %s4083_s6 = sld [smem:[#allocation31_spill]] }
  0x78   : > { %s3043_s27 = scalar_lea.hbm %s4083_s6, 16 }
  0x79   : > { %p3044_p1 = scmp.ne.s32.totalorder %s4083_s6, %s3043_s27  ;;  %p3050_p12 = scmp.lt.u32.totalorder %s3043_s27, %s4083_s6 }
  0x7b   : > { %p3046_p3 = pnand %p3044_p1, %p3473_p8 }
  0x7d   : > { %p3047_p11 = pneg %p3046_p3 }
  0x7f   : > { %p3052_p13 = pnand %p3050_p12, %p3047_p11 }
  0x81   : > { %3055 = shalt.err (!%p3052_p13)
}
  0x82   : > { %s3056_s2 = scalar_lea.vmem %s533_s9, 16  ;;  %s3063_s17 = scalar_lea.vmem %s533_s9, 32 }
  0x83   : > { %p3057_p0 = scmp.ne.s32.totalorder %s533_s9, %s3056_s2  ;;  %p3064_p7 = scmp.lt.s32.totalorder %s533_s9, %s533_s9 }
  0x84   : > { %p3065_p9 = scmp.lt.s32.totalorder %s3063_s17, %s3056_s2 }
  0x85   : > { %p3059_p2 = pnand %p3057_p0, %p3473_p8 }
  0x86   : > { %p3066_p5 = por %p3065_p9, %p3064_p7 }
  0x87   : > { %p3060_p4 = pneg %p3059_p2 }
  0x89   : > { %p3067_p10 = pnand %p3066_p5, %p3060_p4 }
  0x8b   : > { %3070 = shalt.err (!%p3067_p10)
}
  0x8c   : > { %2815 = dma.hbm_to_vmem [thread:$0]  (!%p3457_p6), %s4083_s6, 16, %s533_s9, [#allocation8]  }
  0x8d   : > { %s4084_s8 = sld [smem:[#allocation33_spill]] }
  0x93   : > { %s3071_s25 = scalar_lea.hbm %s4084_s8, 16 }
  0x94   : > { %p3072_p1 = scmp.ne.s32.totalorder %s4084_s8, %s3071_s25  ;;  %p3078_p12 = scmp.lt.u32.totalorder %s3071_s25, %s4084_s8 }
  0x96   : > { %p3074_p3 = pnand %p3072_p1, %p3473_p8 }
  0x98   : > { %p3075_p11 = pneg %p3074_p3 }
  0x9a   : > { %p3080_p13 = pnand %p3078_p12, %p3075_p11 }
  0x9c   : > { %3083 = shalt.err (!%p3080_p13)
}
  0x9d   : > { %s3084_s28 = scalar_lea.vmem %s557_s15, 16  ;;  %s3091_s9 = scalar_lea.vmem %s557_s15, 32 }
  0x9e   : > { %p3085_p0 = scmp.ne.s32.totalorder %s557_s15, %s3084_s28  ;;  %p3092_p7 = scmp.lt.s32.totalorder %s557_s15, %s557_s15 }
  0x9f   : > { %p3093_p9 = scmp.lt.s32.totalorder %s3091_s9, %s3084_s28 }
  0xa0   : > { %p3087_p2 = pnand %p3085_p0, %p3473_p8 }
  0xa1   : > { %p3094_p5 = por %p3093_p9, %p3092_p7 }
  0xa2   : > { %p3088_p4 = pneg %p3087_p2 }
  0xa4   : > { %p3095_p10 = pnand %p3094_p5, %p3088_p4 }
  0xa6   : > { %3098 = shalt.err (!%p3095_p10)
}
  0xa7   : > { %2821 = dma.hbm_to_vmem [thread:$0]  (!%p3457_p6), %s4084_s8, 16, %s557_s15, [#allocation11]  }
  0xa8   : > { %s3292_s18 = smov [#allocation15]   ;;  %s3293_s13 = smov [#allocation16]  }
  0xa9   : > { %s581_s4 = sshll.u32 %s3292_s18, 4  ;;  %s592_s19 = sshll.u32 %s3293_s13, 4  ;;  %s582_s4 = int_to_ptr.vmem [resolvable:$true] %s581_s4  ;;  %s593_s19 = int_to_ptr.vmem [resolvable:$true] %s592_s19 }
  0xaa   : > { %s3099_s29 = scalar_lea.hbm %s4038_s11, 16 }
  0xab   : > { %p3100_p1 = scmp.ne.s32.totalorder %s4038_s11, %s3099_s29  ;;  %p3106_p12 = scmp.lt.u32.totalorder %s3099_s29, %s4038_s11 }
  0xad   : > { %p3102_p3 = pnand %p3100_p1, %p3473_p8 }
  0xaf   : > { %p3103_p11 = pneg %p3102_p3 }
  0xb1   : > { %p3108_p13 = pnand %p3106_p12, %p3103_p11 }
  0xb3   : > { %3111 = shalt.err (!%p3108_p13)
}
  0xb4   : > { %s3112_s15 = scalar_lea.vmem %s582_s4, 16  ;;  %s3119_s2 = scalar_lea.vmem %s582_s4, 32 }
  0xb5   : > { %p3113_p0 = scmp.ne.s32.totalorder %s582_s4, %s3112_s15  ;;  %p3120_p7 = scmp.lt.s32.totalorder %s582_s4, %s582_s4 }
  0xb6   : > { %p3121_p9 = scmp.lt.s32.totalorder %s3119_s2, %s3112_s15 }
  0xb7   : > { %p3115_p2 = pnand %p3113_p0, %p3473_p8 }
  0xb8   : > { %p3122_p5 = por %p3121_p9, %p3120_p7 }
  0xb9   : > { %p3116_p4 = pneg %p3115_p2 }
  0xbb   : > { %p3123_p10 = pnand %p3122_p5, %p3116_p4 }
  0xbd   : > { %3126 = shalt.err (!%p3123_p10)
}
  0xbe   : > { %2827 = dma.hbm_to_vmem [thread:$0]  (!%p3457_p6), %s4038_s11, 16, %s582_s4, [#allocation14]  }
  0xbf   : > { %s3127_s27 = scalar_lea.hbm %s4039_s12, 16 }
  0xc0   : > { %p3128_p1 = scmp.ne.s32.totalorder %s4039_s12, %s3127_s27  ;;  %p3134_p12 = scmp.lt.u32.totalorder %s3127_s27, %s4039_s12 }
  0xc2   : > { %p3130_p3 = pnand %p3128_p1, %p3473_p8 }
  0xc4   : > { %p3131_p11 = pneg %p3130_p3 }
  0xc6   : > { %p3136_p13 = pnand %p3134_p12, %p3131_p11 }
  0xc8   : > { %3139 = shalt.err (!%p3136_p13)
}
  0xc9   : > { %s3140_s9 = scalar_lea.vmem %s593_s19, 16  ;;  %s3147_s4 = scalar_lea.vmem %s593_s19, 32 }
  0xca   : > { %p3141_p0 = scmp.ne.s32.totalorder %s593_s19, %s3140_s9  ;;  %p3148_p7 = scmp.lt.s32.totalorder %s593_s19, %s593_s19 }
  0xcb   : > { %p3149_p9 = scmp.lt.s32.totalorder %s3147_s4, %s3140_s9 }
  0xcc   : > { %p3143_p2 = pnand %p3141_p0, %p3473_p8 }
  0xcd   : > { %p3150_p5 = por %p3149_p9, %p3148_p7 }
  0xce   : > { %p3144_p4 = pneg %p3143_p2 }
  0xd0   : > { %p3151_p10 = pnand %p3150_p5, %p3144_p4 }
  0xd2   : > { %3154 = shalt.err (!%p3151_p10)
}
  0xd3   : > { %2830 = dma.hbm_to_vmem [thread:$0]  (!%p3457_p6), %s4039_s12, 16, %s593_s19, [#allocation17]  }
  0xd4   : > { %s2576_s14 = sadd.s32 4294967294, %s3283_s22   ;;  %s51_s17 = sadd.s32 1, %s3279_s1 }
  0xd5   : > { %s112_s26 = sadd.s32 1, %s3271_s20  ;;  %p53_p8 = scmp.ge.s32.totalorder %s51_s17, 2 }
  0xd6   : > { %p119_p1 = scmp.ne.s32.totalorder %s3271_s20, %s3267_s30  ;;  %p120_p3 = scmp.eq.s32.totalorder %s3283_s22, 0 }
  0xd7   : > { %p125_p11 = scmp.ne.s32.totalorder %s3267_s30, %s3263_s0  ;;  %s4117_s17 = smov (%p53_p8, %s51_s17), 0 }
  0xd8   : > { %p3618_p12 = por %p120_p3, %p119_p1  ;;  %p4086_p13 = scmp.ne.s32.totalorder %s4077_s23, 0 }
  0xd9   : > { %s109_s13 = ssub.s32 %s3279_s1, %s4117_s17  ;;  %s4088_s25 = sadd.s32 4294967295, %s3283_s22  }
  0xda   : > { %p3624_p6 = por %p4086_p13, %p125_p11  ;;  %p487_p0 = scmp.eq.s32.totalorder %s4088_s25, 1 }
  0xdb   : > { %p110_p2 = scmp.eq.s32.totalorder %s109_s13, 0  ;;  %p493_p4 = scmp.eq.s32.totalorder %s2576_s14, 1 }
  0xdc   : > { %p3632_p7 = por %p487_p0, %p119_p1  ;;  %p2846_p9 = scmp.lt.s32.totalorder %s3283_s22, 2 }
  0xdd   : > { %s3638_s29 = scalar_select %p110_p2, %s3271_s20, %s112_s26  }
  0xde   : > { %s4089_s27 = scalar_select %p3632_p7, 1, 0 }
  0xdf   : > { %p3640_p5 = por %p493_p4, %p125_p11  ;;  %s638_s3 = sand.u32 1, %s3271_s20  }
  0xe0   : > { %s2586_s28 = sshll.u32 %s3279_s1, 4  ;;  %s641_s9 = scalar_lea.vmem [#allocation4], %s638_s3 }
  0xe1   : > { %s4090_s16 = scalar_select %p3640_p5, 1, 0 }
  0xe2   : > { %s648_s4 = sshll.u32 %s641_s9, 4  ;;  %s4091_s25 = sld [smem:[#allocation27_spill]]  ;;  %s3651_s4 = int_to_ptr.vmem [resolvable:$true] %s648_s4 }
  0xe3   : > { %p3655_p10 = pnand %p2846_p9, %p3618_p12  ;;  %s639_s26 = scalar_lea.sflag [#allocation5], %s638_s3 }
  0xe5   : > { %p3157_p1 = pneg %p3655_p10 }
  0xe8   : > { %s3649_s13 = scalar_lea.hbm %s4091_s25, %s2586_s28  ;;  %s3160_s2 = scalar_lea.hbm %s4091_s25, 32 }
  0xe9   : > { %s3155_s9 = scalar_lea.hbm %s3649_s13, 16  ;;  %p3161_p12 = scmp.lt.u32.totalorder %s3649_s13, %s4091_s25 }
  0xea   : > { %p3156_p8 = scmp.ne.s32.totalorder %s3649_s13, %s3155_s9  ;;  %p3162_p13 = scmp.lt.u32.totalorder %s3160_s2, %s3155_s9 }
  0xeb   : > { %p3164_p2 = scmp.lt.u32.totalorder %s3155_s9, %s3649_s13 }
  0xec   : > { %p3158_p3 = pnand %p3157_p1, %p3156_p8  ;;  %p3163_p0 = por %p3162_p13, %p3161_p12 }
  0xee   : > { %p3159_p11 = pneg %p3158_p3  ;;  %p3165_p4 = por %p3164_p2, %p3163_p0 }
  0xf0   : > { %p3166_p9 = pnand %p3165_p4, %p3159_p11 }
  0xf2   : > { %3169 = shalt.err (!%p3166_p9)
}
  0xf3   : > { %s3170_s3 = scalar_lea.vmem %s3651_s4, 16  ;;  %s3294_s28 = smov [#allocation4]  }
  0xf4   : > { %p3171_p8 = scmp.ne.s32.totalorder %s3651_s4, %s3170_s3  ;;  %s3175_s15 = sshll.u32 %s3294_s28, 4  ;;  %s3176_s15 = int_to_ptr.vmem [resolvable:$false] %s3175_s15 }
  0xf5   : > { %s3177_s5 = scalar_lea.vmem %s3176_s15, 32  ;;  %p3178_p7 = scmp.lt.s32.totalorder %s3651_s4, %s3176_s15 }
  0xf6   : > { %p3173_p3 = pnand %p3171_p8, %p3157_p1  ;;  %p3179_p12 = scmp.lt.s32.totalorder %s3177_s5, %s3170_s3 }
  0xf8   : > { %p3174_p5 = pneg %p3173_p3  ;;  %p3180_p13 = por %p3179_p12, %p3178_p7 }
  0xfa   : > { %p3181_p0 = pnand %p3180_p13, %p3174_p5 }
  0xfc   : > { %3184 = shalt.err (!%p3181_p0)
}
  0xfd   : > { %2834 = dma.hbm_to_vmem [thread:$0]  (!%p3655_p10), %s3649_s13, 16, %s3651_s4, %s639_s26  }
  0xfe   : > { %p4093_p11 = scmp.ne.s32.totalorder %s4078_s24, 0 }
  0xff   : > { %s3687_s9 = sand.u32 (!%p4093_p11), 1, %s3267_s30  }
 0x100   : > { %657 = sbr.rel (%p4093_p11) target bundleno = 2865 (0xb31), region = 96  ;;  %s660_s2 = scalar_lea.sflag (!%p4093_p11), [#allocation5], %s3687_s9 }
 0x107   : > { %3238 = dma.done.wait (%p3624_p6), %s660_s2, 16  }
 0x108   : > { %3240 = vsyncadd (%p3624_p6), %s660_s2, 4294967280  ;;  %p4094_p7 = scmp.ne.s32.totalorder %s4077_s23, 0 }
 0x10a   : > { %3242 = dma.done.wait (%p4094_p7), [#allocation8], 272  }
 0x10b   : > { %3244 = vsyncadd (%p4094_p7), [#allocation8], 4294967024 }
 0x10c   : > { %3246 = dma.done.wait (%p4094_p7), [#allocation11], 272  }
 0x10d   : > { %3248 = vsyncadd (%p4094_p7), [#allocation11], 4294967024 }
 0x10e   : > { %3250 = dma.done.wait (%p4094_p7), [#allocation14], 32  }
 0x10f   : > { %3252 = vsyncadd (%p4094_p7), [#allocation14], 4294967264 }
 0x110   : > { %3254 = dma.done.wait (%p4094_p7), [#allocation17], 16  }
 0x111   : > { %3256 = vsyncadd (%p4094_p7), [#allocation17], 4294967280  ;;  %p755_p6 = scmp.lt.s32.totalorder %s3275_s21, 1  ;;  %v3295_v0 = vmov 0.0   ;;  %vm3296_vm0 = vmmov 0   ;;  %s4095_s13 = sld [smem:[#allocation25_spill]]  ;;  %v914_v28 = vlaneseq }
 0x112   : > { %2677 = vmatprep.subr.bf16.mxu0 %v3295_v0  ;;  %2681 = vmatprep.mubr.msk.bf16.mxu0 %vm3296_vm0, %v3295_v0  ;;  %v2923_v1 = vld [vmem:[#allocation7] sm:$0xff]   ;;  %v2924_v2 = vld [vmem:[#allocation7 + $0x8] sm:$0xff]   ;;  %vm796_vm1 = vcmask 261120   ;;  %s4096_s28 = sld [smem:[#allocation28_spill]]  ;;  %s4097_s2 = sld [smem:[#allocation26_spill]]  ;;  %v2927_v24 = vld [vmem:[#allocation10] sm:$0xff]  }
 0x113   : > { %s756_s24 = scalar_select %p755_p6, %s3275_s21, 1  ;;  %2685 = vmatprep.subr.bf16.mxu1 %v3295_v0  ;;  %2689 = vmatprep.mubr.msk.bf16.mxu1 %vm3296_vm0, %v3295_v0  ;;  %v2598_v9 = vld [vmem:[#allocation9] ss:$0 sm:$0xff]  ;;  %v2928_v25 = vld [vmem:[#allocation10 + $0x8] sm:$0xff]   ;;  %v3300_v26 = vmov 1983009808  }
 0x114   : > { %2678 = vmatpush3.bf16.msra.mxu0 %v2923_v1  ;;  %s3299_s26 = smov 112   ;;  %2686 = vmatpush3.bf16.msra.mxu1 %v2927_v24  ;;  %v912_v27 = vunpack.c.l.s4 %v3300_v26  ;;  %v3301_v29 = vmov 1934713408   ;;  %v915_v32 = vshrl.u32 %v914_v28, 7  ;;  %v3302_v47 = vmov 0   ;;  %s4099_s3 = scalar_lea.vmem [#allocation4], %s3687_s9 }
 0x115   : > { %s2596_s19 = sshll.u32 %s756_s24, 3  ;;  %2679 = vmatprep.subr.bf16.mxu0 %v3295_v0  ;;  %2687 = vmatprep.subr.bf16.mxu1 %v3295_v0  ;;  %v929_v30 = vunpack.c.l.s4 %v3301_v29  ;;  %vm1183_vm2 = vcmask 60416   ;;  %vm1508_vm3 = vcmask 64512   ;;  %vm1748_vm4 = vcmask 1043456   ;;  %s3305_s23 = smov 24  }
 0x116   : > { %v913_v31 = vunpack.c.0.s8 %v912_v27  ;;  %vm2101_vm5 = vcmask 130048   ;;  %vm2104_vm6 = vcmask 195584   ;;  %s4102_s4 = sld [smem:[#allocation37_spill]]  ;;  %s4103_s24 = sld [smem:[#allocation36_spill]]  ;;  %vm2315_vm7 = vcmask 523264  }
 0x117   : > { %s758_s14 = scalar_lea.vmem %s4095_s13, %s2596_s19  ;;  %v930_v33 = vunpack.c.0.s8 %v929_v30  ;;  %s2595_s13 = sshll.u32 %s3687_s9, 3 }
 0x118   : > { %v771_v3 = vld [vmem:[%s758_s14] sm:$0xff]  ;;  %s765_s18 = scalar_lea.vmem %s4097_s2, %s2596_s19  ;;  %2680 = vmatpush3.bf16.msra.mxu0 %v2924_v2  ;;  %v2926_v7 = vld [vmem:[%s4096_s28 + $0x8] sm:$0xff]   ;;  %s3298_s19 = smov 120   ;;  %2688 = vmatpush3.bf16.msra.mxu1 %v2928_v25  ;;  %v3759_v34 = vsub.s32 %v913_v31, %v915_v32 }
 0x119   : > { %v2925_v4 = vld [vmem:[%s4096_s28] sm:$0xff]   ;;  %v772_v5 = vpack.c.bf16 %v771_v3, %v771_v3  ;;  %2693 = vmatprep.subr.bf16.mxu0 %v3295_v0  ;;  %s4098_s14 = sld [smem:[#allocation29_spill]]  ;;  %2701 = vmatprep.subr.bf16.mxu1 %v3295_v0  ;;  %v3762_v38 = vsub.s32 %v930_v33, %v915_v32  ;;  %s4100_s2 = sld [smem:[#allocation34_spill]] }
 0x11a   : > { %v3730_v6 = vld [vmem:[%s765_s18] sm:$0xff]  ;;  %s3297_s18 = smov 104   ;;  %s4105_s15 = sld [smem:[#allocation39_spill]] }
 0x11b   : > { %2682 = vmatmul.mubr.msk.bf16.vlgmr.msra.gmra.mrb[0].mxu0 %vm796_vm1, %v772_v5  ;;  %v1260_v8 = vpack.c.bf16 %v3730_v6, %v3730_v6  ;;  %2690 = vmatmul.mubr.msk.bf16.vlgmr.msra.gmra.mrb[0].mxu1 %vm796_vm1, %v772_v5  ;;  %s4107_s7 = sld [smem:[#allocation41_spill]]  ;;  %p4108_p10 = scmp.ne.s32.totalorder %s4089_s27, 0 }
 0x11c   : > { %2694 = vmatpush3.bf16.msra.mxu0 %v2925_v4  ;;  %2697 = vmatprep.mubr.msk.bf16.mxu0 %vm3296_vm0, %v3295_v0 }
 0x11d   : > { %2695 = vmatprep.subr.bf16.mxu0 %v3295_v0  ;;  %2703 = vmatprep.mubr.msk.bf16.mxu1 %vm3296_vm0, %v3295_v0 }
 0x11f   : > { %v2606_v16 = vld [vmem:[%s4098_s14] ss:$0 sm:$0xff]  ;;  %s2391_s14 = scalar_lea.sflag [#allocation6], %s3687_s9 }
 0x120   : > { %2696 = vmatpush3.bf16.msra.mxu0 %v2926_v7 }
 0x121   : > { %2707 = vmatprep.subr.bf16.mxu0 %v3295_v0 }
 0x123   : > { %2698 = vmatmul.mubr.msk.bf16.vlgmr.msra.gmra.mrb[4].mxu0 %vm796_vm1, %v1260_v8 }
 0x124   : > { %2709 = vmatprep.mubr.msk.bf16.mxu0 %vm3296_vm0, %v3295_v0 }
 0x1ee   : > { %v834_v10 = vpop.f32.mrb[0].mxu0 }
 0x1ef   : > { %v835_v11 = vadd.f32 %v2598_v9, %v834_v10  ;;  %v2683_v12 = vpop.f32.mrb[1].mxu0 }
 0x1f0   : > { %v837_v13 = vpop.f32.mrb[2].mxu0 }
 0x1f1   : > { %v903_v14 = vpack.c.bf16 %v835_v11, %v835_v11  ;;  %v2684_v15 = vpop.f32.mrb[3].mxu0 }
 0x1f3   : > { %909 = vrot.lane.b32.xlu1 %v903_v14, %s3297_s18  ;;  %905 = vrot.lane.b32.xlu0 %v903_v14, %s3298_s19  ;;  %v917_v46 = vrot.slane %v903_v14, %v3759_v34 }
 0x1f6   : > { %v1322_v17 = vpop.f32.mrb[4].mxu0 }
 0x1f7   : > { %v1323_v18 = vadd.f32 %v2606_v16, %v1322_v17  ;;  %907 = vrot.lane.b32.xlu0 %v903_v14, %s3299_s26  ;;  %v2699_v19 = vpop.f32.mrb[5].mxu0 }
 0x1f8   : > { %v1325_v20 = vpop.f32.mrb[6].mxu0 }
 0x1f9   : > { %v1328_v21 = vmul.f32 0.35355338, %v1323_v18  ;;  %v2700_v22 = vpop.f32.mrb[7].mxu0 }
 0x1fb   : > { %v1329_v23 = vpack.c.bf16 %v1328_v21, %v1328_v21 }
 0x1fd   : > { %1333 = vrot.lane.b32.xlu0 %v1329_v23, %s3299_s26  ;;  %1331 = vrot.lane.b32.xlu1 %v1329_v23, %s3298_s19  ;;  %v1343_v52 = vrot.slane %v1329_v23, %v3759_v34 }
 0x201   : > { %1335 = vrot.lane.b32.xlu1 %v1329_v23, %s3297_s18 }
 0x265   : > { %v910_v35 = vpop.permute.xlu1 %909  ;;  %v906_v36 = vpop.permute.xlu0 %905 }
 0x266   : > { %v959_v37 = vrot.slane %v910_v35, %v3759_v34  ;;  %v951_v39 = vrot.slane %v906_v36, %v3759_v34 }
 0x268   : > { %v960_v40 = vcombine.low %v951_v39, %v959_v37  ;;  %v961_v41 = vcombine.high %v951_v39, %v959_v37 }
 0x269   : > { %v908_v42 = vpop.permute.xlu0 %907 }
 0x26a   : > { %v968_v43 = vrot.slane %v960_v40, %v3762_v38  ;;  %v975_v44 = vrot.slane %v961_v41, %v3762_v38  ;;  %v925_v45 = vrot.slane %v908_v42, %v3759_v34 }
 0x26c   : > { %v976_v48 = vcombine.high %v968_v43, %v3302_v47  ;;  %v977_v49 = vcombine.high %v975_v44, %v3302_v47  ;;  %v926_v50 = vcombine.low %v917_v46, %v925_v45  ;;  %v927_v51 = vcombine.high %v917_v46, %v925_v45 }
 0x26d   : > { %v983_v53 = vshrl.u32 %v968_v43, 16  ;;  %v999_v54 = vshrl.u32 %v975_v44, 16 }
 0x26e   : > { %v934_v55 = vrot.slane %v926_v50, %v3762_v38  ;;  %v941_v56 = vrot.slane %v927_v51, %v3762_v38  ;;  %v991_v59 = vshrl.u32 %v976_v48, 16  ;;  %v1007_v60 = vshrl.u32 %v977_v49, 16 }
 0x26f   : > { %v1334_v57 = vpop.permute.xlu0 %1333  ;;  %v1332_v58 = vpop.permute.xlu1 %1331 }
 0x270   : > { %v1351_v61 = vrot.slane %v1334_v57, %v3759_v34  ;;  %v1377_v62 = vrot.slane %v1332_v58, %v3759_v34  ;;  %v942_v63 = vcombine.high %v934_v55, %v3302_v47  ;;  %v943_v1 = vcombine.high %v941_v56, %v3302_v47 }
 0x271   : > { %v980_v2 = vpack.i.b16 %v968_v43, %v934_v55  ;;  %v982_v3 = vshrl.u32 %v934_v55, 16  ;;  %v996_v4 = vpack.i.b16 %v975_v44, %v941_v56  ;;  %v998_v5 = vshrl.u32 %v941_v56, 16 }
 0x272   : > { %v1352_v7 = vcombine.low %v1343_v52, %v1351_v61  ;;  %v1353_v8 = vcombine.high %v1343_v52, %v1351_v61  ;;  %v988_v10 = vpack.i.b16 %v976_v48, %v942_v63  ;;  %v990_v11 = vshrl.u32 %v942_v63, 16 }
 0x273   : > { %v984_v9 = vpack.i.b16 %v983_v53, %v982_v3  ;;  %v1004_v12 = vpack.i.b16 %v977_v49, %v943_v1  ;;  %v1336_v13 = vpop.permute.xlu1 %1335  ;;  %v1000_v14 = vpack.i.b16 %v999_v54, %v998_v5  ;;  %v1006_v15 = vshrl.u32 %v943_v1, 16 }
 0x274   : > { %v1117_v16 = vcombine.low %v980_v2, %v996_v4  ;;  %v1360_v17 = vrot.slane %v1352_v7, %v3762_v38  ;;  %v992_v18 = vpack.i.b16 %v991_v59, %v990_v11  ;;  %v1367_v20 = vrot.slane %v1353_v8, %v3762_v38 }
 0x275   : > { %v1125_v19 = vcombine.low %v988_v10, %v1004_v12  ;;  %v1385_v21 = vrot.slane %v1336_v13, %v3759_v34  ;;  %v1008_v22 = vpack.i.b16 %v1007_v60, %v1006_v15  ;;  %v1142_v23 = vcombine.low %v984_v9, %v1000_v14 }
 0x276   : > { %v1124_v24 = vrot.slane %v1117_v16, %v3759_v34  ;;  %v1368_v26 = vcombine.high %v1360_v17, %v3302_v47  ;;  %v1369_v28 = vcombine.high %v1367_v20, %v3302_v47  ;;  %v1408_v35 = vshrl.u32 %v1360_v17, 16 }
 0x277   : > { %v1132_v25 = vrot.slane %v1125_v19, %v3759_v34  ;;  %v1150_v27 = vcombine.low %v992_v18, %v1008_v22  ;;  %v1386_v29 = vcombine.low %v1377_v62, %v1385_v21  ;;  %v1387_v31 = vcombine.high %v1377_v62, %v1385_v21 }
 0x278   : > { %v1149_v32 = vrot.slane %v1142_v23, %v3759_v34  ;;  %v1416_v39 = vshrl.u32 %v1368_v26, 16  ;;  %v1424_v40 = vshrl.u32 %v1367_v20, 16  ;;  %v1432_v43 = vshrl.u32 %v1369_v28, 16 }
 0x279   : > { %v1133_v30 = vcombine.low %v1124_v24, %v1132_v25  ;;  %v1157_v33 = vrot.slane %v1150_v27, %v3759_v34  ;;  %v1394_v36 = vrot.slane %v1386_v29, %v3762_v38  ;;  %v1401_v41 = vrot.slane %v1387_v31, %v3762_v38 }
 0x27b   : > { %v1140_v37 = vrot.slane %v1133_v30, %v3762_v38  ;;  %v1158_v42 = vcombine.low %v1149_v32, %v1157_v33  ;;  %v1402_v44 = vcombine.high %v1394_v36, %v3302_v47  ;;  %v1409_v45 = vshrl.u32 %v1394_v36, 16 }
 0x27c   : > { %v1403_v49 = vcombine.high %v1401_v41, %v3302_v47  ;;  %v1406_v50 = vpack.i.b16 %v1394_v36, %v1360_v17  ;;  %v1422_v54 = vpack.i.b16 %v1401_v41, %v1367_v20  ;;  %v1425_v56 = vshrl.u32 %v1401_v41, 16 }
 0x27d   : > { %v1141_v46 = vcombine.high %v1140_v37, %v3302_v47  ;;  %v1171_v48 = vshrl.u32 %v1140_v37, 16  ;;  %v1165_v51 = vrot.slane %v1158_v42, %v3762_v38  ;;  %v1414_v52 = vpack.i.b16 %v1402_v44, %v1368_v26 }
 0x27e   : > { %v1417_v53 = vshrl.u32 %v1402_v44, 16  ;;  %v1410_v55 = vpack.i.b16 %v1409_v45, %v1408_v35  ;;  %v1430_v57 = vpack.i.b16 %v1403_v49, %v1369_v28  ;;  %v1433_v58 = vshrl.u32 %v1403_v49, 16  ;;  %v2610_v44 = vld [vmem:[%s4099_s3] ss:$0 sm:$0xff] }
 0x27f   : > { %v1166_v59 = vcombine.high %v1165_v51, %v3302_v47  ;;  %v1169_v60 = vpack.i.b16 %v1165_v51, %v1140_v37  ;;  %v1172_v61 = vshrl.u32 %v1165_v51, 16  ;;  %v1179_v63 = vshrl.u32 %v1141_v46, 16 }
 0x280   : > { %v1418_v62 = vpack.i.b16 %v1417_v53, %v1416_v39  ;;  %v1426_v1 = vpack.i.b16 %v1425_v56, %v1424_v40  ;;  %v1434_v2 = vpack.i.b16 %v1433_v58, %v1432_v43  ;;  %v1444_v3 = vcombine.low %v1414_v52, %v1430_v57  ;;  %v897_v40 = vpop.f32.mrb[0].mxu1 }
 0x281   : > { %v1173_v4 = vpack.i.b16 %v1172_v61, %v1171_v48  ;;  %v1177_v5 = vpack.i.b16 %v1166_v59, %v1141_v46  ;;  %v1180_v7 = vshrl.u32 %v1166_v59, 16  ;;  %1184 = vst.msk [vmem:[#allocation2] sm:$0xf] %vm1183_vm2, %v1169_v60  ;;  %v1436_v8 = vcombine.low %v1406_v50, %v1422_v54  ;;  %v2691_v41 = vpop.f32.mrb[1].mxu1 }
 0x282   : > { %v1461_v9 = vcombine.low %v1410_v55, %v1426_v1  ;;  %v1469_v10 = vcombine.low %v1418_v62, %v1434_v2  ;;  %v1451_v12 = vrot.slane %v1444_v3, %v3759_v34  ;;  %v900_v42 = vpop.f32.mrb[2].mxu1 }
 0x283   : > { %v1181_v11 = vpack.i.b16 %v1180_v7, %v1179_v63  ;;  %1185 = vst.msk [vmem:[#allocation2 + $0x4] sm:$0xf] %vm1183_vm2, %v1173_v4  ;;  %1186 = vst.msk [vmem:[#allocation2 + $0x8] sm:$0xf] %vm1183_vm2, %v1177_v5  ;;  %v1443_v15 = vrot.slane %v1436_v8, %v3759_v34  ;;  %v2692_v43 = vpop.f32.mrb[3].mxu1 }
 0x284   : > { %v1468_v13 = vrot.slane %v1461_v9, %v3759_v34  ;;  %v1476_v14 = vrot.slane %v1469_v10, %v3759_v34  ;;  %v2602_v7 = vld [vmem:[#allocation12] ss:$0 sm:$0xff] }
 0x285   : > { %1187 = vst.msk [vmem:[#allocation2 + $0xc] sm:$0xf] %vm1183_vm2, %v1181_v11  ;;  %v1452_v17 = vcombine.low %v1443_v15, %v1451_v12  ;;  %v898_v9 = vadd.f32 %v2602_v7, %v897_v40 }
 0x286   : > { %v1477_v16 = vcombine.low %v1468_v13, %v1476_v14 }
 0x287   : > { %v1459_v23 = vrot.slane %v1452_v17, %v3762_v38  ;;  %v1010_v10 = vpack.c.bf16 %v898_v9, %v898_v9 }
 0x288   : > { %v1498_v18 = vld [vmem:[#allocation2] sm:$0xf]  ;;  %v1484_v20 = vrot.slane %v1477_v16, %v3762_v38 }
 0x289   : > { %v1513_v19 = vsel %vm1508_vm3, %v1498_v18, 0  ;;  %v1489_v27 = vshrl.u32 %v1459_v23, 16  ;;  %v1460_v33 = vcombine.high %v1459_v23, %v3302_v47 }
 0x28a   : > { %2702 = vmatpush3.bf16.xpose.msra.mxu1 %v1513_v19  ;;  %v1499_v21 = vld [vmem:[#allocation2 + $0x4] sm:$0xf]  ;;  %v1490_v24 = vshrl.u32 %v1484_v20, 16  ;;  %v1500_v25 = vld [vmem:[#allocation2 + $0x8] sm:$0xf]  ;;  %v1488_v26 = vpack.i.b16 %v1484_v20, %v1459_v23  ;;  %v1485_v31 = vcombine.high %v1484_v20, %v3302_v47 }
 0x28b   : > { %v1559_v22 = vsel %vm1508_vm3, %v1499_v21, 0  ;;  %2713 = vmatprep.subr.bf16.mxu1 %v3295_v0  ;;  %v1605_v29 = vsel %vm1508_vm3, %v1500_v25, 0  ;;  %v1495_v37 = vshrl.u32 %v1460_v33, 16 }
 0x28c   : > { %2708 = vmatpush3.bf16.xpose.msra.mxu0 %v1559_v22  ;;  %v1501_v28 = vld [vmem:[#allocation2 + $0xc] sm:$0xf]  ;;  %v1491_v30 = vpack.i.b16 %v1490_v24, %v1489_v27  ;;  %v1496_v35 = vshrl.u32 %v1485_v31, 16  ;;  %v1494_v36 = vpack.i.b16 %v1485_v31, %v1460_v33 }
 0x28d   : > { %2719 = vmatprep.subr.bf16.mxu0 %v3295_v0  ;;  %v1651_v32 = vsel %vm1508_vm3, %v1501_v28, 0 }
 0x28e   : > { %v1497_v39 = vpack.i.b16 %v1496_v35, %v1495_v37  ;;  %v1024_v35 = vrot.slane %v1010_v10, %v3759_v34 }
 0x291   : > { %2704 = vmatmul.mubr.msk.bf16.vlgmr.msra.gmra.mrb[4].mxu1 %vm1508_vm3, %v1488_v26 }
 0x292   : > { %2714 = vmatpush3.bf16.xpose.msra.mxu1 %v1605_v29  ;;  %2715 = vmatprep.mubr.msk.bf16.mxu1 %vm3296_vm0, %v3295_v0 }
 0x293   : > { %2710 = vmatmul.mubr.msk.bf16.vlgmr.msra.gmra.mrb[8].mxu0 %vm1508_vm3, %v1491_v30  ;;  %2725 = vmatprep.subr.bf16.mxu1 %v3295_v0 }
 0x294   : > { %2720 = vmatpush3.bf16.xpose.msra.mxu0 %v1651_v32  ;;  %2721 = vmatprep.mubr.msk.bf16.mxu0 %vm3296_vm0, %v3295_v0 }
 0x295   : > { %2731 = vmatprep.subr.bf16.mxu0 %v3295_v0 }
 0x299   : > { %2716 = vmatmul.mubr.msk.bf16.vlgmr.msra.gmra.mrb[8].mxu1 %vm1508_vm3, %v1494_v36 }
 0x29a   : > { %2727 = vmatprep.mubr.msk.bf16.mxu1 %vm3296_vm0, %v3295_v0 }
 0x29b   : > { %2722 = vmatmul.mubr.msk.bf16.vlgmr.msra.gmra.mrb[12].mxu0 %vm1508_vm3, %v1497_v39 }
 0x29c   : > { %2733 = vmatprep.mubr.msk.bf16.mxu0 %vm3296_vm0, %v3295_v0 }
 0x364   : > { %v1549_v45 = vpop.f32.mrb[4].mxu1 }
 0x365   : > { %v1550_v46 = vadd.f32 %v2610_v44, %v1549_v45  ;;  %v2705_v48 = vpop.f32.mrb[5].mxu1 }
 0x366   : > { %v1552_v49 = vpop.f32.mrb[6].mxu1  ;;  %v1595_v50 = vpop.f32.mrb[8].mxu0 }
 0x367   : > { %v1596_v51 = vadd.f32 %v2610_v44, %v1595_v50  ;;  %v2706_v52 = vpop.f32.mrb[7].mxu1  ;;  %v2711_v53 = vpop.f32.mrb[9].mxu0  ;;  %v1693_v54 = vsel %vm1508_vm3, %v1550_v46, -inf }
 0x368   : > { %1694 = vmax.xlane.f32.xlu0 %v1693_v54  ;;  %v1598_v55 = vpop.f32.mrb[10].mxu0 }
 0x369   : > { %v2712_v56 = vpop.f32.mrb[11].mxu0  ;;  %v1696_v57 = vsel %vm1508_vm3, %v1596_v51, -inf }
 0x36a   : > { %1697 = vmax.xlane.f32.xlu1 %v1696_v57 }
 0x36c   : > { %v1641_v58 = vpop.f32.mrb[8].mxu1 }
 0x36d   : > { %v1642_v59 = vadd.f32 %v2610_v44, %v1641_v58  ;;  %v2717_v60 = vpop.f32.mrb[9].mxu1 }
 0x36e   : > { %v1644_v61 = vpop.f32.mrb[10].mxu1  ;;  %v1687_v62 = vpop.f32.mrb[12].mxu0 }
 0x36f   : > { %v1688_v63 = vadd.f32 %v2610_v44, %v1687_v62  ;;  %v2718_v1 = vpop.f32.mrb[11].mxu1  ;;  %v2723_v2 = vpop.f32.mrb[13].mxu0  ;;  %v1699_v3 = vsel %vm1508_vm3, %v1642_v59, -inf }
 0x370   : > { %1700 = vmax.xlane.f32.xlu0 %v1699_v3  ;;  %v1690_v4 = vpop.f32.mrb[14].mxu0 }
 0x371   : > { %v2724_v5 = vpop.f32.mrb[15].mxu0  ;;  %v1702_v8 = vsel %vm1508_vm3, %v1688_v63, -inf }
 0x374   : > { %1703 = vmax.xlane.f32.xlu0 %v1702_v8 }
 0x37b   : > { %1012 = vrot.lane.b32.xlu1 %v1010_v10, %s3298_s19  ;;  %s3304_s19 = smov 16  }
 0x37f   : > { %1016 = vrot.lane.b32.xlu1 %v1010_v10, %s3297_s18  ;;  %s3303_s18 = smov 8  }
 0x38a   : > { %1014 = vrot.lane.b32.xlu0 %v1010_v10, %s3299_s26  ;;  %s4101_s26 = sld [smem:[#allocation35_spill]] }
 0x3f5   : > { %v1695_v11 = vpop.xlane.xlu0 %1694 }
 0x3f6   : > { %v1705_v12 = vsub.f32 %v1550_v46, %v1695_v11 }
 0x3f7   : > { %v1698_v13 = vpop.xlane.xlu1 %1697 }
 0x3f8   : > { %v1709_v14 = vmul.f32 1.442695, %v1705_v12  ;;  %v1706_v15 = vsub.f32 %v1596_v51, %v1698_v13 }
 0x3fa   : > { %2937 = vpow2.f32 %v1709_v14  ;;  %v1711_v16 = vmul.f32 1.442695, %v1706_v15 }
 0x3fb   : > { %v1013_v17 = vpop.permute.xlu1 %1012 }
 0x3fc   : > { %2939 = vpow2.f32 %v1711_v16  ;;  %v1058_v21 = vrot.slane %v1013_v17, %v3759_v34 }
 0x3fd   : > { %v1701_v18 = vpop.xlane.xlu0 %1700 }
 0x3fe   : > { %v1707_v19 = vsub.f32 %v1642_v59, %v1701_v18 }
 0x3ff   : > { %v1017_v20 = vpop.permute.xlu1 %1016 }
 0x400   : > { %v1713_v22 = vmul.f32 1.442695, %v1707_v19  ;;  %v1066_v23 = vrot.slane %v1017_v20, %v3759_v34 }
 0x401   : > { %v1704_v24 = vpop.xlane.xlu0 %1703 }
 0x402   : > { %2941 = vpow2.f32 %v1713_v22  ;;  %v1067_v25 = vcombine.low %v1058_v21, %v1066_v23  ;;  %v1708_v26 = vsub.f32 %v1688_v63, %v1704_v24  ;;  %v1068_v28 = vcombine.high %v1058_v21, %v1066_v23 }
 0x404   : > { %v3838_v27 = vpop.eup %2937  ;;  %v1715_v29 = vmul.f32 1.442695, %v1708_v26  ;;  %v1075_v33 = vrot.slane %v1067_v25, %v3762_v38  ;;  %v1082_v39 = vrot.slane %v1068_v28, %v3762_v38 }
 0x405   : > { %v1015_v30 = vpop.permute.xlu0 %1014  ;;  %v1717_v31 = vsel %vm1508_vm3, %v3838_v27, 0.0 }
 0x406   : > { %v3842_v32 = vpop.eup %2939  ;;  %1718 = vadd.xlane.f32.xlu1 %v1717_v31  ;;  %2943 = vpow2.f32 %v1715_v29  ;;  %v1032_v36 = vrot.slane %v1015_v30, %v3759_v34  ;;  %v1083_v42 = vcombine.high %v1075_v33, %v3302_v47  ;;  %v1084_v46 = vcombine.high %v1082_v39, %v3302_v47 }
 0x407   : > { %v1720_v37 = vsel %vm1508_vm3, %v3842_v32, 0.0  ;;  %v1090_v48 = vshrl.u32 %v1075_v33, 16  ;;  %v1106_v49 = vshrl.u32 %v1082_v39, 16 }
 0x408   : > { %1721 = vadd.xlane.f32.xlu0 %v1720_v37  ;;  %v1033_v40 = vcombine.low %v1024_v35, %v1032_v36  ;;  %v1034_v41 = vcombine.high %v1024_v35, %v1032_v36  ;;  %v1098_v54 = vshrl.u32 %v1083_v42, 16  ;;  %v1114_v62 = vshrl.u32 %v1084_v46, 16 }
 0x40a   : > { %v1041_v43 = vrot.slane %v1033_v40, %v3762_v38  ;;  %v1048_v44 = vrot.slane %v1034_v41, %v3762_v38 }
 0x40c   : > { %v3853_v45 = vpop.eup %2941  ;;  %v1049_v50 = vcombine.high %v1041_v43, %v3302_v47  ;;  %v1050_v51 = vcombine.high %v1048_v44, %v3302_v47  ;;  %v1087_v52 = vpack.i.b16 %v1075_v33, %v1041_v43  ;;  %v1089_v53 = vshrl.u32 %v1041_v43, 16 }
 0x40d   : > { %v1103_v55 = vpack.i.b16 %v1082_v39, %v1048_v44  ;;  %v1105_v56 = vshrl.u32 %v1048_v44, 16  ;;  %v1723_v57 = vsel %vm1508_vm3, %v3853_v45, 0.0 }
 0x40e   : > { %v1091_v58 = vpack.i.b16 %v1090_v48, %v1089_v53  ;;  %v1095_v59 = vpack.i.b16 %v1083_v42, %v1049_v50  ;;  %v1097_v60 = vshrl.u32 %v1049_v50, 16  ;;  %v1111_v61 = vpack.i.b16 %v1084_v46, %v1050_v51  ;;  %1724 = vadd.xlane.f32.xlu0 %v1723_v57  ;;  %v2929_v57 = vld [vmem:[%s4100_s2] sm:$0xff]  }
 0x40f   : > { %v1107_v63 = vpack.i.b16 %v1106_v49, %v1105_v56  ;;  %v1113_v1 = vshrl.u32 %v1050_v51, 16  ;;  %v1188_v2 = vcombine.low %v1087_v52, %v1103_v55 }
 0x410   : > { %v3860_v3 = vpop.eup %2943  ;;  %v1099_v4 = vpack.i.b16 %v1098_v54, %v1097_v60  ;;  %v1196_v5 = vcombine.low %v1095_v59, %v1111_v61 }
 0x411   : > { %v1115_v7 = vpack.i.b16 %v1114_v62, %v1113_v1  ;;  %v1213_v8 = vcombine.low %v1091_v58, %v1107_v63  ;;  %v1726_v9 = vsel %vm1508_vm3, %v3860_v3, 0.0  ;;  %v1195_v10 = vrot.slane %v1188_v2, %v3759_v34 }
 0x412   : > { %v1203_v11 = vrot.slane %v1196_v5, %v3759_v34  ;;  %1727 = vadd.xlane.f32.xlu1 %v1726_v9 }
 0x413   : > { %v1221_v12 = vcombine.low %v1099_v4, %v1115_v7  ;;  %v1220_v14 = vrot.slane %v1213_v8, %v3759_v34 }
 0x414   : > { %v1204_v13 = vcombine.low %v1195_v10, %v1203_v11 }
 0x415   : > { %v1228_v15 = vrot.slane %v1221_v12, %v3759_v34 }
 0x416   : > { %v1211_v16 = vrot.slane %v1204_v13, %v3762_v38 }
 0x417   : > { %v1229_v17 = vcombine.low %v1220_v14, %v1228_v15 }
 0x418   : > { %v1212_v18 = vcombine.high %v1211_v16, %v3302_v47  ;;  %v1242_v22 = vshrl.u32 %v1211_v16, 16 }
 0x419   : > { %v1236_v19 = vrot.slane %v1229_v17, %v3762_v38 }
 0x41a   : > { %v1250_v26 = vshrl.u32 %v1212_v18, 16 }
 0x41b   : > { %v1237_v20 = vcombine.high %v1236_v19, %v3302_v47  ;;  %v1240_v21 = vpack.i.b16 %v1236_v19, %v1211_v16  ;;  %v1243_v23 = vshrl.u32 %v1236_v19, 16 }
 0x41d   : > { %v1244_v24 = vpack.i.b16 %v1243_v23, %v1242_v22  ;;  %v1248_v25 = vpack.i.b16 %v1237_v20, %v1212_v18  ;;  %v1251_v28 = vshrl.u32 %v1237_v20, 16  ;;  %1254 = vst.msk [vmem:[#allocation3] sm:$0xf] %vm1183_vm2, %v1240_v21 }
 0x41f   : > { %v1252_v29 = vpack.i.b16 %v1251_v28, %v1250_v26  ;;  %1255 = vst.msk [vmem:[#allocation3 + $0x4] sm:$0xf] %vm1183_vm2, %v1244_v24  ;;  %1256 = vst.msk [vmem:[#allocation3 + $0x8] sm:$0xf] %vm1183_vm2, %v1248_v25 }
 0x421   : > { %1257 = vst.msk [vmem:[#allocation3 + $0xc] sm:$0xf] %vm1183_vm2, %v1252_v29 }
 0x424   : > { %v1741_v30 = vld [vmem:[#allocation3] sm:$0xf] }
 0x425   : > { %v1750_v31 = vsel %vm1748_vm4, %v1741_v30, 0 }
 0x426   : > { %2726 = vmatpush3.bf16.msra.mxu1 %v1750_v31  ;;  %v1742_v33 = vld [vmem:[#allocation3 + $0x4] sm:$0xf]  ;;  %v1743_v44 = vld [vmem:[#allocation3 + $0x8] sm:$0xf] }
 0x427   : > { %v1796_v35 = vsel %vm1748_vm4, %v1742_v33, 0  ;;  %2737 = vmatprep.subr.bf16.mxu1 %v3295_v0  ;;  %v1842_v50 = vsel %vm1748_vm4, %v1743_v44, 0 }
 0x428   : > { %2732 = vmatpush3.bf16.msra.mxu0 %v1796_v35  ;;  %v1744_v49 = vld [vmem:[#allocation3 + $0xc] sm:$0xf] }
 0x429   : > { %2743 = vmatprep.subr.bf16.mxu0 %v3295_v0 }
 0x493   : > { %v1719_v36 = vpop.xlane.xlu1 %1718 }
 0x494   : > { %2945 = vrcp.f32 %v1719_v36 }
 0x495   : > { %v1722_v37 = vpop.xlane.xlu0 %1721 }
 0x496   : > { %2947 = vrcp.f32 %v1722_v37 }
 0x49b   : > { %v1725_v39 = vpop.xlane.xlu0 %1724 }
 0x49c   : > { %2949 = vrcp.f32 %v1725_v39 }
 0x49e   : > { %v2946_v40 = vpop.eup %2945 }
 0x49f   : > { %v1733_v41 = vmul.f32 %v2946_v40, %v3838_v27  ;;  %v1728_v43 = vpop.xlane.xlu1 %1727  ;;  %v1888_v27 = vsel %vm1748_vm4, %v1744_v49, 0 }
 0x4a0   : > { %v2948_v42 = vpop.eup %2947  ;;  %2951 = vrcp.f32 %v1728_v43 }
 0x4a1   : > { %v1734_v46 = vmul.f32 %v2948_v42, %v3842_v32  ;;  %v1737_v48 = vpack.c.bf16 %v1733_v41, %v1733_v41 }
 0x4a3   : > { %2728 = vmatmul.mubr.msk.bf16.vlgmr.msra.gmra.mrb[12].mxu1 %vm1508_vm3, %v1737_v48  ;;  %v1738_v51 = vpack.c.bf16 %v1734_v46, %v1734_v46 }
 0x4a4   : > { %2738 = vmatpush3.bf16.msra.mxu1 %v1842_v50  ;;  %2739 = vmatprep.mubr.msk.bf16.mxu1 %vm3296_vm0, %v3295_v0 }
 0x4a5   : > { %2734 = vmatmul.mubr.msk.bf16.vlgmr.msra.gmra.mrb[16].mxu0 %vm1508_vm3, %v1738_v51  ;;  %2749 = vmatprep.subr.bf16.mxu1 %v3295_v0 }
 0x4a6   : > { %2744 = vmatpush3.bf16.msra.mxu0 %v1888_v27  ;;  %2745 = vmatprep.mubr.msk.bf16.mxu0 %vm3296_vm0, %v3295_v0  ;;  %v2950_v32 = vpop.eup %2949 }
 0x4a7   : > { %2757 = vmatprep.subr.bf16.mxu0 %v3295_v0  ;;  %v1735_v52 = vmul.f32 %v2950_v32, %v3853_v45 }
 0x4a9   : > { %v1739_v53 = vpack.c.bf16 %v1735_v52, %v1735_v52 }
 0x4aa   : > { %v2952_v54 = vpop.eup %2951 }
 0x4ab   : > { %v1736_v55 = vmul.f32 %v2952_v54, %v3860_v3  ;;  %2740 = vmatmul.mubr.msk.bf16.vlgmr.msra.gmra.mrb[16].mxu1 %vm1508_vm3, %v1739_v53 }
 0x4ac   : > { %2753 = vmatprep.mubr.msk.bf16.mxu1 %vm3296_vm0, %v3295_v0  ;;  %2750 = vmatpush3.bf16.msra.mxu1 %v2929_v57 }
 0x4ad   : > { %v1740_v56 = vpack.c.bf16 %v1736_v55, %v1736_v55  ;;  %2751 = vmatprep.subr.bf16.mxu1 %v3295_v0 }
 0x4af   : > { %2746 = vmatmul.mubr.msk.bf16.vlgmr.msra.gmra.mrb[20].mxu0 %vm1508_vm3, %v1740_v56  ;;  %v2930_v56 = vld [vmem:[%s4100_s2 + $0x8] sm:$0xff]  }
 0x4b0   : > { %2761 = vmatprep.mubr.msk.bf16.mxu0 %vm3296_vm0, %v3295_v0  ;;  %2752 = vmatpush3.bf16.msra.mxu1 %v2930_v56 }
 0x4b1   : > { %2765 = vmatprep.subr.bf16.mxu1 %v3295_v0 }
 0x576   : > { %v1786_v45 = vpop.f32.mrb[12].mxu1 }
 0x577   : > { %v2729_v58 = vpop.f32.mrb[13].mxu1  ;;  %v1930_v2 = vpack.c.bf16 %v1786_v45, %v1786_v45 }
 0x578   : > { %v1789_v59 = vpop.f32.mrb[14].mxu1  ;;  %v1832_v60 = vpop.f32.mrb[16].mxu0 }
 0x579   : > { %v2730_v61 = vpop.f32.mrb[15].mxu1  ;;  %v2735_v62 = vpop.f32.mrb[17].mxu0  ;;  %v1937_v8 = vrot.slane %v1930_v2, %v3759_v34  ;;  %v1964_v11 = vpack.c.bf16 %v1832_v60, %v1832_v60 }
 0x57a   : > { %v1835_v63 = vpop.f32.mrb[18].mxu0 }
 0x57b   : > { %v2736_v1 = vpop.f32.mrb[19].mxu0  ;;  %v1971_v21 = vrot.slane %v1964_v11, %v3759_v34 }
 0x57e   : > { %v1878_v3 = vpop.f32.mrb[16].mxu1 }
 0x57f   : > { %v1938_v4 = vpack.c.bf16 %v1878_v3, %v1878_v3  ;;  %v2741_v5 = vpop.f32.mrb[17].mxu1 }
 0x580   : > { %v1881_v7 = vpop.f32.mrb[18].mxu1 }
 0x581   : > { %v1945_v9 = vrot.slane %v1938_v4, %v3759_v34  ;;  %v2742_v10 = vpop.f32.mrb[19].mxu1 }
 0x582   : > { %v1924_v12 = vpop.f32.mrb[20].mxu0 }
 0x583   : > { %v1946_v13 = vcombine.low %v1937_v8, %v1945_v9  ;;  %v1947_v14 = vcombine.high %v1937_v8, %v1945_v9  ;;  %v1972_v15 = vpack.c.bf16 %v1924_v12, %v1924_v12  ;;  %v2747_v16 = vpop.f32.mrb[21].mxu0 }
 0x584   : > { %v1927_v17 = vpop.f32.mrb[22].mxu0 }
 0x585   : > { %v1954_v18 = vrot.slane %v1946_v13, %v3762_v38  ;;  %v1979_v19 = vrot.slane %v1972_v15, %v3759_v34  ;;  %v2748_v20 = vpop.f32.mrb[23].mxu0  ;;  %v1961_v22 = vrot.slane %v1947_v14, %v3762_v38  ;;  %v2619_v14 = vld [vmem:[#allocation13] ss:$0 sm:$0xff] }
 0x587   : > { %v1980_v23 = vcombine.low %v1971_v21, %v1979_v19  ;;  %v1981_v24 = vcombine.high %v1971_v21, %v1979_v19  ;;  %v1962_v25 = vcombine.high %v1954_v18, %v3302_v47  ;;  %v1963_v29 = vcombine.high %v1961_v22, %v3302_v47 }
 0x588   : > { %v2002_v30 = vshrl.u32 %v1954_v18, 16  ;;  %v2018_v39 = vshrl.u32 %v1961_v22, 16 }
 0x589   : > { %v1988_v26 = vrot.slane %v1980_v23, %v3762_v38  ;;  %v1995_v28 = vrot.slane %v1981_v24, %v3762_v38  ;;  %v2010_v37 = vshrl.u32 %v1962_v25, 16  ;;  %v2026_v48 = vshrl.u32 %v1963_v29, 16 }
 0x58b   : > { %v1996_v31 = vcombine.high %v1988_v26, %v3302_v47  ;;  %v1997_v33 = vcombine.high %v1995_v28, %v3302_v47  ;;  %v2000_v35 = vpack.i.b16 %v1988_v26, %v1954_v18  ;;  %v2003_v36 = vshrl.u32 %v1988_v26, 16 }
 0x58c   : > { %v2016_v40 = vpack.i.b16 %v1995_v28, %v1961_v22  ;;  %v2019_v41 = vshrl.u32 %v1995_v28, 16  ;;  %v2931_v28 = vld [vmem:[%s4101_s26] sm:$0xff]  }
 0x58d   : > { %v2004_v42 = vpack.i.b16 %v2003_v36, %v2002_v30  ;;  %v2008_v43 = vpack.i.b16 %v1996_v31, %v1962_v25  ;;  %v2011_v44 = vshrl.u32 %v1996_v31, 16  ;;  %v2024_v46 = vpack.i.b16 %v1997_v33, %v1963_v29  ;;  %2758 = vmatpush3.bf16.msra.mxu0 %v2931_v28 }
 0x58e   : > { %v2020_v49 = vpack.i.b16 %v2019_v41, %v2018_v39  ;;  %v2027_v50 = vshrl.u32 %v1997_v33, 16  ;;  %v2030_v51 = vcombine.low %v2000_v35, %v2016_v40  ;;  %2759 = vmatprep.subr.bf16.mxu0 %v3295_v0  ;;  %v2623_v35 = vld [vmem:[#allocation15] ss:$0 sm:$0xff] }
 0x58f   : > { %v2012_v27 = vpack.i.b16 %v2011_v44, %v2010_v37  ;;  %v2038_v32 = vcombine.low %v2008_v43, %v2024_v46  ;;  %v2624_v37 = vld [vmem:[#allocation16] ss:$0 sm:$0xff]  ;;  %v2935_v44 = vld [vmem:[%s4102_s4 + $0x10] sm:$0xff]   ;;  %v2936_v46 = vld [vmem:[%s4102_s4 + $0x18] sm:$0xff]  }
 0x590   : > { %v2028_v52 = vpack.i.b16 %v2027_v50, %v2026_v48  ;;  %v2055_v53 = vcombine.low %v2004_v42, %v2020_v49  ;;  %v2037_v54 = vrot.slane %v2030_v51, %v3759_v34  ;;  %v2933_v42 = vld [vmem:[%s4102_s4] sm:$0xff]   ;;  %v2934_v43 = vld [vmem:[%s4102_s4 + $0x8] sm:$0xff]  }
 0x591   : > { %v2045_v55 = vrot.slane %v2038_v32, %v3759_v34  ;;  %v2625_v48 = vld [vmem:[%s4103_s24] ss:$0 sm:$0xff] }
 0x592   : > { %v2063_v57 = vcombine.low %v2012_v27, %v2028_v52  ;;  %v2062_v58 = vrot.slane %v2055_v53, %v3759_v34 }
 0x593   : > { %v2046_v45 = vcombine.low %v2037_v54, %v2045_v55 }
 0x594   : > { %v2070_v59 = vrot.slane %v2063_v57, %v3759_v34 }
 0x595   : > { %v2053_v60 = vrot.slane %v2046_v45, %v3762_v38 }
 0x596   : > { %v2071_v61 = vcombine.low %v2062_v58, %v2070_v59 }
 0x597   : > { %v2054_v63 = vcombine.high %v2053_v60, %v3302_v47  ;;  %v2083_v1 = vshrl.u32 %v2053_v60, 16 }
 0x598   : > { %v2078_v62 = vrot.slane %v2071_v61, %v3762_v38 }
 0x599   : > { %v2089_v8 = vshrl.u32 %v2054_v63, 16 }
 0x59a   : > { %v2084_v2 = vshrl.u32 %v2078_v62, 16  ;;  %v2079_v3 = vcombine.high %v2078_v62, %v3302_v47  ;;  %v2082_v4 = vpack.i.b16 %v2078_v62, %v2053_v60 }
 0x59c   : > { %v2085_v5 = vpack.i.b16 %v2084_v2, %v2083_v1  ;;  %v2088_v7 = vpack.i.b16 %v2079_v3, %v2054_v63  ;;  %v2090_v9 = vshrl.u32 %v2079_v3, 16 }
 0x59e   : > { %2092 = vrot.lane.b32.xlu0 %v2085_v5, %s3303_s18  ;;  %2094 = vrot.lane.b32.xlu1 %v2088_v7, %s3304_s19  ;;  %v2091_v34 = vpack.i.b16 %v2090_v9, %v2089_v8  ;;  %s4106_s18 = sld [smem:[#allocation40_spill]]  ;;  %s2638_s19 = sshll.u32 %s3275_s21, 7 }
 0x59f   : > { %s3977_s8 = scalar_lea.hbm %s4107_s7, %s2638_s19  ;;  %s3306_s21 = smov [#allocation18]  }
 0x5a2   : > { %2096 = vrot.lane.b32.xlu1 %v2091_v34, %s3305_s23  ;;  %s4104_s23 = sld [smem:[#allocation38_spill]] }
 0x5a8   : > { %v2629_v57 = vld [vmem:[%s4104_s23] ss:$0 sm:$0xff]  ;;  %s754_s23 = scalar_lea.vmem [#allocation18], %s2595_s13  ;;  %s3189_s13 = sshll.u32 %s3306_s21, 4  ;;  %s3190_s13 = int_to_ptr.vmem [resolvable:$false] %s3189_s13 }
 0x5a9   : > { %s2405_s2 = sshll.u32 %s754_s23, 4  ;;  %s3979_s2 = int_to_ptr.vmem [resolvable:$true] %s2405_s2 }
 0x5aa   : > { %s3185_s3 = scalar_lea.vmem %s3979_s2, 128  ;;  %p3192_p4 = scmp.lt.s32.totalorder %s3979_s2, %s3190_s13 }
 0x5ab   : > { %p3186_p5 = scmp.ne.s32.totalorder %s3979_s2, %s3185_s3 }
 0x5ad   : > { %p3187_p1 = pnand %p3186_p5, %p4108_p10 }
 0x5af   : > { %p3188_p2 = pneg %p3187_p1 }
 0x610   : > { %v2093_v10 = vpop.permute.xlu0 %2092  ;;  %v2095_v38 = vpop.permute.xlu1 %2094 }
 0x611   : > { %v2100_v11 = vsel %vm1508_vm3, %v2082_v4, %v2093_v10  ;;  %v2635_v10 = vld [vmem:[%s4105_s15] ss:$0 sm:$0xff]  ;;  %s3191_s15 = scalar_lea.vmem %s3190_s13, 256 }
 0x612   : > { %v2103_v12 = vsel %vm2101_vm5, %v2100_v11, %v2095_v38  ;;  %v2636_v11 = vld [vmem:[%s4106_s18] ss:$0 sm:$0xff]  ;;  %p3193_p9 = scmp.lt.s32.totalorder %s3191_s15, %s3185_s3 }
 0x614   : > { %v2097_v47 = vpop.permute.xlu1 %2096  ;;  %p3194_p8 = por %p3193_p9, %p3192_p4 }
 0x615   : > { %v2106_v13 = vsel %vm2104_vm6, %v2103_v12, %v2097_v47 }
 0x616   : > { %2754 = vmatmul.mubr.msk.bf16.vlgmr.msra.gmra.mrb[20].mxu1 %vm796_vm1, %v2106_v13  ;;  %p3195_p3 = pnand %p3194_p8, %p3188_p2 }
 0x617   : > { %2773 = vmatprep.mubr.msk.bf16.mxu1 %vm3296_vm0, %v3295_v0  ;;  %2766 = vmatpush3.bf16.msra.mxu1 %v2933_v42 }
 0x618   : > { %2767 = vmatprep.subr.bf16.mxu1 %v3295_v0 }
 0x61b   : > { %2768 = vmatpush3.bf16.msra.mxu1 %v2934_v43 }
 0x61c   : > { %2769 = vmatprep.subr.bf16.mxu1 %v3295_v0 }
 0x61f   : > { %2770 = vmatpush3.bf16.msra.mxu1 %v2935_v44 }
 0x620   : > { %2771 = vmatprep.subr.bf16.mxu1 %v3295_v0 }
 0x623   : > { %2772 = vmatpush3.bf16.msra.mxu1 %v2936_v46 }
 0x6e9   : > { %v2166_v15 = vpop.f32.mrb[20].mxu1 }
 0x6ea   : > { %v2167_v16 = vadd.f32 %v2619_v14, %v2166_v15  ;;  %v2755_v17 = vpop.f32.mrb[21].mxu1 }
 0x6eb   : > { %v2169_v18 = vpop.f32.mrb[22].mxu1 }
 0x6ec   : > { %v2756_v19 = vpop.f32.mrb[23].mxu1  ;;  %v2172_v20 = vadd.f32 %v2167_v16, %v3730_v6  ;;  %v2932_v6 = vld [vmem:[%s4101_s26 + $0x8] sm:$0xff]  }
 0x6ed   : > { %2760 = vmatpush3.bf16.msra.mxu0 %v2932_v6 }
 0x6ee   : > { %v2175_v21 = vsel %vm796_vm1, %v2172_v20, 0.0 }
 0x6ef   : > { %2176 = vadd.xlane.f32.xlu0 %v2175_v21 }
 0x77c   : > { %v2177_v22 = vpop.xlane.xlu0 %2176 }
 0x77d   : > { %v2179_v23 = vmul.f32 0.03125, %v2177_v22 }
 0x77f   : > { %v2180_v24 = vsub.f32 %v2172_v20, %v2179_v23 }
 0x781   : > { %v2181_v25 = vmul.f32 %v2180_v24, %v2180_v24 }
 0x783   : > { %v2182_v26 = vsel %vm796_vm1, %v2181_v25, 0.0 }
 0x784   : > { %2183 = vadd.xlane.f32.xlu1 %v2182_v26 }
 0x811   : > { %v2184_v29 = vpop.xlane.xlu1 %2183 }
 0x812   : > { %v2185_v30 = vmul.f32 0.03125, %v2184_v29 }
 0x814   : > { %v2186_v31 = vadd.f32 1e-12, %v2185_v30 }
 0x816   : > { %2953 = vrsqrt.f32 %v2186_v31 }
 0x820   : > { %v2954_v33 = vpop.eup %2953 }
 0x821   : > { %v2188_v36 = vmul.f32 %v2954_v33, %v2180_v24 }
 0x823   : > { %v2195_v39 = vmul.f32 %v2623_v35, %v2188_v36 }
 0x825   : > { %v2202_v40 = vadd.f32 %v2624_v37, %v2195_v39 }
 0x827   : > { %v2203_v41 = vpack.c.bf16 %v2202_v40, %v2202_v40 }
 0x829   : > { %2762 = vmatmul.mubr.msk.bf16.vlgmr.msra.gmra.mrb[24].mxu0 %vm796_vm1, %v2203_v41 }
 0x8fc   : > { %v2264_v49 = vpop.f32.mrb[24].mxu0 }
 0x8fd   : > { %v2265_v50 = vadd.f32 %v2625_v48, %v2264_v49  ;;  %v2763_v51 = vpop.f32.mrb[25].mxu0 }
 0x8fe   : > { %v2267_v27 = vpop.f32.mrb[26].mxu0 }
 0x8ff   : > { %v2271_v32 = vmul.f32 0.70710677, %v2265_v50  ;;  %v2764_v52 = vpop.f32.mrb[27].mxu0  ;;  %v2270_v54 = vmul.f32 0.5, %v2265_v50 }
 0x901   : > { %2955 = verf.f32 %v2271_v32 }
 0x90b   : > { %v2956_v53 = vpop.eup %2955 }
 0x90c   : > { %v2273_v55 = vadd.f32 1.0, %v2956_v53 }
 0x90e   : > { %v2274_v0 = vmul.f32 %v2273_v55, %v2270_v54 }
 0x910   : > { %v2275_v56 = vpack.c.bf16 %v2274_v0, %v2274_v0 }
 0x912   : > { %2774 = vmatmul.mubr.msk.bf16.vlgmr.msra.gmra.mrb[24].mxu1 %vm2315_vm7, %v2275_v56 }
 0x9e5   : > { %v2353_v45 = vpop.f32.mrb[24].mxu1 }
 0x9e6   : > { %v2354_v58 = vadd.f32 %v2629_v57, %v2353_v45  ;;  %v2775_v59 = vpop.f32.mrb[25].mxu1 }
 0x9e7   : > { %v2356_v60 = vpop.f32.mrb[26].mxu1 }
 0x9e8   : > { %v2776_v61 = vpop.f32.mrb[27].mxu1  ;;  %v2359_v62 = vadd.f32 %v2354_v58, %v2202_v40 }
 0x9ea   : > { %v2362_v63 = vsel %vm796_vm1, %v2359_v62, 0.0 }
 0x9eb   : > { %2363 = vadd.xlane.f32.xlu0 %v2362_v63 }
 0xa78   : > { %v2364_v1 = vpop.xlane.xlu0 %2363 }
 0xa79   : > { %v2365_v2 = vmul.f32 0.03125, %v2364_v1 }
 0xa7b   : > { %v2366_v3 = vsub.f32 %v2359_v62, %v2365_v2 }
 0xa7d   : > { %v2367_v4 = vmul.f32 %v2366_v3, %v2366_v3 }
 0xa7f   : > { %v2368_v5 = vsel %vm796_vm1, %v2367_v4, 0.0 }
 0xa80   : > { %2369 = vadd.xlane.f32.xlu0 %v2368_v5 }
 0xb0d   : > { %v2370_v7 = vpop.xlane.xlu0 %2369 }
 0xb0e   : > { %v2371_v8 = vmul.f32 0.03125, %v2370_v7 }
 0xb10   : > { %v2372_v9 = vadd.f32 1e-12, %v2371_v8 }
 0xb12   : > { %2957 = vrsqrt.f32 %v2372_v9 }
 0xb1c   : > { %v2958_v34 = vpop.eup %2957 }
 0xb1d   : > { %v2374_v38 = vmul.f32 %v2958_v34, %v2366_v3 }
 0xb1f   : > { %v2381_v12 = vmul.f32 %v2635_v10, %v2374_v38 }
 0xb21   : > { %v2388_v47 = vadd.f32 %v2636_v11, %v2381_v12 }
 0xb23   : > { %2389 = vst.msk [vmem:[%s754_s23] sm:$0xff] %vm796_vm1, %v2388_v47 }
 0xb24   : > { %3198 = shalt.err (!%p3195_p3)
}
 0xb25   : > { %s3199_s6 = scalar_lea.hbm %s3977_s8, 128  ;;  %s3203_s5 = scalar_lea.hbm %s4107_s7, 256 }
 0xb26   : > { %p3200_p12 = scmp.ne.s32.totalorder %s3977_s8, %s3199_s6  ;;  %p3204_p11 = scmp.lt.u32.totalorder %s3977_s8, %s4107_s7 }
 0xb27   : > { %p3205_p7 = scmp.lt.u32.totalorder %s3203_s5, %s3199_s6  ;;  %p3207_p5 = scmp.lt.u32.totalorder %s3199_s6, %s3977_s8 }
 0xb28   : > { %p3201_p13 = pnand %p3200_p12, %p4108_p10 }
 0xb29   : > { %p3206_p6 = por %p3205_p7, %p3204_p11 }
 0xb2a   : > { %p3202_p0 = pneg %p3201_p13 }
 0xb2b   : > { %p3208_p1 = por %p3207_p5, %p3206_p6 }
 0xb2d   : > { %p3209_p2 = pnand %p3208_p1, %p3202_p0 }
 0xb2f   : > { %3212 = shalt.err (!%p3209_p2)
}
 0xb30   : > { %2807 = dma.vmem_to_hbm [thread:$0]  (%p4108_p10), %s3979_s2, 128, %s3977_s8, %s2391_s14  }
 0xb31 PF: > { %s2417_s19 = sand.u32 1, %s3263_s0   ;;  %p4109_p4 = scmp.ne.s32.totalorder %s4090_s16, 0 }
 0xb32   : > { %p4110_p9 = scmp.ge.s32.totalorder %s3283_s22, 2  ;;  %s2418_s23 = scalar_lea.sflag [#allocation6], %s2417_s19 }
 0xb34   : > { %p2836_p8 = pnand %p4110_p9, %p4109_p4 }
 0xb36   : > { %3258 = dma.done.wait (!%p2836_p8), %s2418_s23, 128  }
 0xb37   : > { %3260 = vsyncadd (!%p2836_p8), %s2418_s23, 4294967168  ;;  %s39_s22 = sadd.s32 1, %s3283_s22   ;;  %s4111_s0 = smov %s3267_s30 }
 0xb38   : > { %p36_p3 = scmp.ge.s32.totalorder %s39_s22, 4   ;;  %s4112_s30 = smov %s3271_s20 }
 0xb39   : > { %s4113_s20 = smov %s3638_s29  ;;  %s4114_s21 = smov %s3279_s1 }
 0xb3a   : > { %s4115_s1 = smov %s4117_s17  ;;  %38 = sbr.rel (!%p36_p3) target bundleno = 28 (0x1c), region = 179 }
 0xb41   :  { %2423 = vsyncpa [#allocation5], 1 }
 0xb42   :  { %2425 = vsyncpa [#allocation5 + $0x1], 1 }
 0xb43   :  { %2426 = vsyncpa [#allocation8], 1 }
 0xb44   :  { %2427 = vsyncpa [#allocation11], 1 }
 0xb45   :  { %2428 = vsyncpa [#allocation14], 1 }
 0xb46   :  { %2429 = vsyncpa [#allocation17], 1 }
 0xb47   :  { %2430 = vsyncpa [#allocation6], 1 }
 0xb48   :  { %2432 = vsyncpa [#allocation6 + $0x1], 1 }

</bundles_post_ra>
